<compile_context>
chip_gen: v7x
topology: tpu7x:2x2x1
jax: 0.10.0
libtpu: 0.0.40
codegen_flags: <defaults>
</compile_context>

<pallas_src>
import functools
from typing import NamedTuple

import jax
import jax.numpy as jnp
from jax.experimental import pallas as pl
from jax.experimental.pallas import tpu as pltpu


def _round_up(x, m):
    return (x + m - 1) // m * m


# ---------------------------------------------------------------------------
# Kernel: fused Linear chain, single (batch) grid axis, all params resident.
# ---------------------------------------------------------------------------
def _autoencoder_kernel(n_layers, *refs):
    """refs = (x, w1, b1, ..., wn, bn, out); all blocks are VMEM resident."""
    x_ref = refs[0]
    out_ref = refs[-1]
    h = x_ref[...].astype(jnp.float32)
    for l in range(n_layers):  # trace-time unrolled -> full LLO visibility
        w = refs[1 + 2 * l][...]
        b = refs[2 + 2 * l][...]
        h = jnp.dot(h.astype(w.dtype), w, preferred_element_type=jnp.float32)
        h = h + b.astype(jnp.float32)
        # TODO(synk): insert hidden-layer activation here if the reference
        # EncoderMLP/DecoderMLP use one (assumed purely linear).
    out_ref[...] = h.astype(out_ref.dtype)


# ---------------------------------------------------------------------------
# One-time parameter preparation (hoisted out of the per-step forward).
# ---------------------------------------------------------------------------
class PreparedParams(NamedTuple):
    weights: tuple   # weights[l]: (K_l, N_l_padded); K_0 = in_dim (unpadded)
    biases: tuple    # biases[l]:  (1, N_l_padded), float32
    in_dim: int
    out_dim: int
    out_cols: int    # lane-dense stored output width (== out_dim if aligned)


def prepare_params(weights, biases, *, param_dtype=None):
    """Pad/cast weights & biases ONCE.

    weights[l]: (in_l, out_l)  -- already transposed from torch's (out, in)
    biases[l]:  (out_l,) or (1, out_l)
    param_dtype: weight storage dtype.  jnp.bfloat16 is recommended on
      v5e/v6e/v7x (MXU is bf16-native; halves weight VMEM/HBM bytes); f32
      accumulation and f32 bias adds are kept inside the kernel either way.
    """
    in_dim = int(weights[0].shape[0])
    out_dim = int(weights[-1].shape[1])
    # Layer output widths padded to a lane-dense multiple of 128.  The first
    # layer's K (= in_dim) is intentionally NOT padded: x stays (B, in_dim) in
    # HBM, avoiding read amplification for small feature dims.
    out_cols = [_round_up(int(w.shape[1]), 128) for w in weights]
    in_cols = [in_dim] + out_cols[:-1]

    w_p, b_p = [], []
    for l, (w, b) in enumerate(zip(weights, biases)):
        w_dtype = w.dtype if param_dtype is None else param_dtype
        wp = jnp.zeros((in_cols[l], out_cols[l]), dtype=w_dtype)
        wp = wp.at[: w.shape[0], : w.shape[1]].set(w.astype(w_dtype))
        b2 = jnp.asarray(b, dtype=jnp.float32).reshape(1, -1)
        bp = jnp.zeros((1, out_cols[l]), dtype=jnp.float32)
        bp = bp.at[:, : b2.shape[1]].set(b2)
        w_p.append(wp)
        b_p.append(bp)
    return PreparedParams(tuple(w_p), tuple(b_p), in_dim, out_dim, out_cols[-1])


def _vmem_capacity_bytes():
    try:
        return int(pltpu.get_tpu_info().vmem_capacity_bytes)
    except Exception:
        return 64 << 20  # conservative fallback (v7x physical VMEM)


# ---------------------------------------------------------------------------
# Forward
# ---------------------------------------------------------------------------
def autoencoder_forward(x, params: PreparedParams, *, tile_b=None):
    """Fused autoencoder forward.  x: (B, input_dim) float32."""
    assert x.ndim == 2, x.shape
    B, in_dim = x.shape
    assert in_dim == params.in_dim, (in_dim, params.in_dim)

    n_layers = len(params.weights)
    n_out = params.out_cols
    max_cols = max([in_dim] + [int(w.shape[1]) for w in params.weights])

    # Per-generation VMEM budget (~54 MiB on v7x, ~109 MiB on v5e/v6e).
    vmem_cap = int(_vmem_capacity_bytes() * 0.85)
    param_bytes = sum(int(w.size) * w.dtype.itemsize for w in params.weights)
    param_bytes += sum(int(b.size) * 4 for b in params.biases)

    if 2 * param_bytes > int(0.6 * vmem_cap):
        # TODO(synk): weight-streaming fallback (pltpu.emit_pipeline over K/N
        # weight tiles) for parameter sets that do not fit fully in VMEM.
        raise ValueError(
            "Autoencoder parameters too large for the fully VMEM-resident "
            "fused kernel on this TPU generation.")

    # Batch tile: multiple of 8 sublanes; >=2 grid steps when B >= 16 so v7x's
    # two TensorCores both get work; clamped by the VMEM activation budget.
    if tile_b is None:
        tile_b = min(_round_up(B, 8), 1024)
        if B >= 16:
            tile_b = min(tile_b, _round_up(pl.cdiv(B, 2), 8))
    tile_b = max(8, _round_up(int(tile_b), 8))
    act_bytes_per_row = 4 * (2 * in_dim + 2 * n_out + 6 * max_cols)
    avail = vmem_cap - 2 * param_bytes  # worst case: double-buffered params
    if avail > 0:
        rows_budget = int(avail * 0.6) // max(act_bytes_per_row, 1)
        if rows_budget >= 8:
            tile_b = min(tile_b, rows_budget // 8 * 8)
    grid = (pl.cdiv(B, tile_b),)

    param_list = [t for wb in zip(params.weights, params.biases) for t in wb]
    kernel = functools.partial(_autoencoder_kernel, n_layers)

    def _run(single_buffer_params):
        spec_kw = {}
        if single_buffer_params:
            # Constant-index weight/bias blocks only need one buffer.
            spec_kw = dict(pipeline_mode=pl.Buffered(1))
        in_specs = [pl.BlockSpec((tile_b, in_dim), lambda i: (i, 0))]
        for w, b in zip(params.weights, params.biases):
            in_specs.append(pl.BlockSpec(w.shape, lambda i: (0, 0), **spec_kw))
            in_specs.append(pl.BlockSpec(b.shape, lambda i: (0, 0), **spec_kw))
        out_spec = pl.BlockSpec((tile_b, n_out), lambda i: (i, 0))

        param_mult = 1 if single_buffer_params else 2
        vmem_needed = param_mult * param_bytes + tile_b * act_bytes_per_row
        vmem_limit = int(min(vmem_cap, max(32 << 20, int(vmem_needed * 1.5))))

        return pl.pallas_call(
            kernel,
            out_shape=jax.ShapeDtypeStruct((B, n_out), x.dtype),
            grid_spec=pltpu.PrefetchScalarGridSpec(
                num_scalar_prefetch=0,
                grid=grid,
                in_specs=in_specs,
                out_specs=out_spec,
            ),
            compiler_params=pltpu.CompilerParams(
                dimension_semantics=("parallel",),
                vmem_limit_bytes=vmem_limit,
            ),
        )(x, *param_list)

    try:
        out = jax.block_until_ready(_run(single_buffer_params=True))
    except Exception:
        # pl.Buffered(1) (single-buffered constant blocks) not accepted by this
        # jax/libtpu version -> fall back to default double-buffering.
        out = _run(single_buffer_params=False)

    if n_out != params.out_dim:
        out = out[:, : params.out_dim]
    return out


# ---------------------------------------------------------------------------
# Reference + deterministic init (mirrors nn.Linear's U(-1/sqrt(fan_in), ...))
# ---------------------------------------------------------------------------
def init_autoencoder_params(key, input_dim, encoder_sizes, latent_dim,
                            decoder_sizes, output_dim, dtype=jnp.float32):
    """Returns weights already transposed to (in, out) and biases as (1, out)."""
    layer_dims = ([input_dim] + list(encoder_sizes) + [latent_dim]
                  + list(decoder_sizes) + [output_dim])
    weights, biases = [], []
    for fan_in, fan_out in zip(layer_dims[:-1], layer_dims[1:]):
        key, kw, kb = jax.random.split(key, 3)
        bound = 1.0 / (fan_in ** 0.5)
        weights.append(jax.random.uniform(kw, (fan_in, fan_out), dtype, -bound, bound))
        biases.append(jax.random.uniform(kb, (1, fan_out), dtype, -bound, bound))
    return weights, biases


def reference_forward(x, weights, biases):
    h = x
    for w, b in zip(weights, biases):
        h = h @ w + b
    return h


if __name__ == "__main__":
    # Small shapes consistent with the module's constructor signature.
    batch = 16
    input_dim = 32
    encoder_sizes = [64, 48]
    latent_dim = 16
    decoder_sizes = [48, 64]
    output_dim = 32

    key = jax.random.PRNGKey(0)
    key, kx = jax.random.split(key)
    x = jax.random.normal(kx, (batch, input_dim), dtype=jnp.float32)

    weights, biases = init_autoencoder_params(
        key, input_dim, encoder_sizes, latent_dim, decoder_sizes, output_dim)
    ref = reference_forward(x, weights, biases)

    # Exact (f32-weight) path; prepared once and reused across calls.
    prepared = prepare_params(weights, biases)
    out = jax.block_until_ready(autoencoder_forward(x, prepared))
    assert out.shape == (batch, output_dim), out.shape
    assert jnp.allclose(out, ref, atol=1e-4, rtol=1e-4), "mismatch vs JAX reference"

    # Multi-grid-step + ragged-last-block path (no batch padding copy).
    key, kx2 = jax.random.split(key)
    x2 = jax.random.normal(kx2, (300, input_dim), dtype=jnp.float32)
    out2 = jax.block_until_ready(autoencoder_forward(x2, prepared, tile_b=128))
    ref2 = reference_forward(x2, weights, biases)
    assert out2.shape == (300, output_dim), out2.shape
    assert jnp.allclose(out2, ref2, atol=1e-4, rtol=1e-4), "tiled path mismatch"

    # bf16-weight fast path (recommended on v5e/v6e/v7x); looser tolerance.
    prepared_bf16 = prepare_params(weights, biases, param_dtype=jnp.bfloat16)
    out3 = jax.block_until_ready(autoencoder_forward(x, prepared_bf16))
    assert out3.shape == (batch, output_dim), out3.shape
    assert jnp.allclose(out3, ref, atol=5e-2, rtol=5e-2), "bf16 path mismatch"

    print("KERNEL_OK")
</pallas_src>

<mosaic_0001>
module attributes {stable_mosaic.version = 11 : i64} {
  func.func @_autoencoder_kernel(%arg0: i32, %arg1: memref<8x32xf32, #tpu.memory_space<vmem>>, %arg2: memref<32x128xf32, #tpu.memory_space<vmem>>, %arg3: memref<1x128xf32, #tpu.memory_space<vmem>>, %arg4: memref<128x128xf32, #tpu.memory_space<vmem>>, %arg5: memref<1x128xf32, #tpu.memory_space<vmem>>, %arg6: memref<128x128xf32, #tpu.memory_space<vmem>>, %arg7: memref<1x128xf32, #tpu.memory_space<vmem>>, %arg8: memref<128x128xf32, #tpu.memory_space<vmem>>, %arg9: memref<1x128xf32, #tpu.memory_space<vmem>>, %arg10: memref<128x128xf32, #tpu.memory_space<vmem>>, %arg11: memref<1x128xf32, #tpu.memory_space<vmem>>, %arg12: memref<128x128xf32, #tpu.memory_space<vmem>>, %arg13: memref<1x128xf32, #tpu.memory_space<vmem>>, %arg14: memref<8x128xf32, #tpu.memory_space<vmem>>) attributes {dimension_semantics = [#tpu.dimension_semantics<parallel>], iteration_bounds = array<i64: 2>, scalar_prefetch = 0 : i64, scratch_operands = 0 : i64, tpu.core_type = #tpu.core_type<tc>, window_params = [{transform_indices = @transform_0, window_bounds = array<i64: 8, 32>}, {pipeline_mode = #tpu.pipeline_mode<synchronous>, transform_indices = @transform_1, window_bounds = array<i64: 32, 128>}, {pipeline_mode = #tpu.pipeline_mode<synchronous>, transform_indices = @transform_2, window_bounds = array<i64: 1, 128>}, {pipeline_mode = #tpu.pipeline_mode<synchronous>, transform_indices = @transform_3, window_bounds = array<i64: 128, 128>}, {pipeline_mode = #tpu.pipeline_mode<synchronous>, transform_indices = @transform_4, window_bounds = array<i64: 1, 128>}, {pipeline_mode = #tpu.pipeline_mode<synchronous>, transform_indices = @transform_5, window_bounds = array<i64: 128, 128>}, {pipeline_mode = #tpu.pipeline_mode<synchronous>, transform_indices = @transform_6, window_bounds = array<i64: 1, 128>}, {pipeline_mode = #tpu.pipeline_mode<synchronous>, transform_indices = @transform_7, window_bounds = array<i64: 128, 128>}, {pipeline_mode = #tpu.pipeline_mode<synchronous>, transform_indices = @transform_8, window_bounds = array<i64: 1, 128>}, {pipeline_mode = #tpu.pipeline_mode<synchronous>, transform_indices = @transform_9, window_bounds = array<i64: 128, 128>}, {pipeline_mode = #tpu.pipeline_mode<synchronous>, transform_indices = @transform_10, window_bounds = array<i64: 1, 128>}, {pipeline_mode = #tpu.pipeline_mode<synchronous>, transform_indices = @transform_11, window_bounds = array<i64: 128, 128>}, {pipeline_mode = #tpu.pipeline_mode<synchronous>, transform_indices = @transform_12, window_bounds = array<i64: 1, 128>}, {transform_indices = @transform_13, window_bounds = array<i64: 8, 128>}]} {
    %c0 = arith.constant 0 : index
    %c0_0 = arith.constant 0 : index
    %0 = vector.load %arg1[%c0, %c0_0] : memref<8x32xf32, #tpu.memory_space<vmem>>, vector<8x32xf32>
    %c0_1 = arith.constant 0 : index
    %c0_2 = arith.constant 0 : index
    %1 = vector.load %arg2[%c0_1, %c0_2] : memref<32x128xf32, #tpu.memory_space<vmem>>, vector<32x128xf32>
    %c0_3 = arith.constant 0 : index
    %c0_4 = arith.constant 0 : index
    %2 = vector.load %arg3[%c0_3, %c0_4] : memref<1x128xf32, #tpu.memory_space<vmem>>, vector<1x128xf32>
    %cst = arith.constant dense<0.000000e+00> : vector<8x128xf32>
    %3 = tpu.matmul %0, %1, %cst {dimension_numbers = #tpu.dot_dimension_numbers<[1], [0], [0], [1], [0, 0, 1, 1], [], []>} : vector<8x32xf32>, vector<32x128xf32>, vector<8x128xf32> -> vector<8x128xf32>
    %4 = vector.broadcast %2 : vector<1x128xf32> to vector<8x128xf32>
    %5 = arith.addf %3, %4 : vector<8x128xf32>
    %c0_5 = arith.constant 0 : index
    %c0_6 = arith.constant 0 : index
    %6 = vector.load %arg4[%c0_5, %c0_6] : memref<128x128xf32, #tpu.memory_space<vmem>>, vector<128x128xf32>
    %c0_7 = arith.constant 0 : index
    %c0_8 = arith.constant 0 : index
    %7 = vector.load %arg5[%c0_7, %c0_8] : memref<1x128xf32, #tpu.memory_space<vmem>>, vector<1x128xf32>
    %cst_9 = arith.constant dense<0.000000e+00> : vector<8x128xf32>
    %8 = tpu.matmul %5, %6, %cst_9 {dimension_numbers = #tpu.dot_dimension_numbers<[1], [0], [0], [1], [0, 0, 1, 1], [], []>} : vector<8x128xf32>, vector<128x128xf32>, vector<8x128xf32> -> vector<8x128xf32>
    %9 = vector.broadcast %7 : vector<1x128xf32> to vector<8x128xf32>
    %10 = arith.addf %8, %9 : vector<8x128xf32>
    %c0_10 = arith.constant 0 : index
    %c0_11 = arith.constant 0 : index
    %11 = vector.load %arg6[%c0_10, %c0_11] : memref<128x128xf32, #tpu.memory_space<vmem>>, vector<128x128xf32>
    %c0_12 = arith.constant 0 : index
    %c0_13 = arith.constant 0 : index
    %12 = vector.load %arg7[%c0_12, %c0_13] : memref<1x128xf32, #tpu.memory_space<vmem>>, vector<1x128xf32>
    %cst_14 = arith.constant dense<0.000000e+00> : vector<8x128xf32>
    %13 = tpu.matmul %10, %11, %cst_14 {dimension_numbers = #tpu.dot_dimension_numbers<[1], [0], [0], [1], [0, 0, 1, 1], [], []>} : vector<8x128xf32>, vector<128x128xf32>, vector<8x128xf32> -> vector<8x128xf32>
    %14 = vector.broadcast %12 : vector<1x128xf32> to vector<8x128xf32>
    %15 = arith.addf %13, %14 : vector<8x128xf32>
    %c0_15 = arith.constant 0 : index
    %c0_16 = arith.constant 0 : index
    %16 = vector.load %arg8[%c0_15, %c0_16] : memref<128x128xf32, #tpu.memory_space<vmem>>, vector<128x128xf32>
    %c0_17 = arith.constant 0 : index
    %c0_18 = arith.constant 0 : index
    %17 = vector.load %arg9[%c0_17, %c0_18] : memref<1x128xf32, #tpu.memory_space<vmem>>, vector<1x128xf32>
    %cst_19 = arith.constant dense<0.000000e+00> : vector<8x128xf32>
    %18 = tpu.matmul %15, %16, %cst_19 {dimension_numbers = #tpu.dot_dimension_numbers<[1], [0], [0], [1], [0, 0, 1, 1], [], []>} : vector<8x128xf32>, vector<128x128xf32>, vector<8x128xf32> -> vector<8x128xf32>
    %19 = vector.broadcast %17 : vector<1x128xf32> to vector<8x128xf32>
    %20 = arith.addf %18, %19 : vector<8x128xf32>
    %c0_20 = arith.constant 0 : index
    %c0_21 = arith.constant 0 : index
    %21 = vector.load %arg10[%c0_20, %c0_21] : memref<128x128xf32, #tpu.memory_space<vmem>>, vector<128x128xf32>
    %c0_22 = arith.constant 0 : index
    %c0_23 = arith.constant 0 : index
    %22 = vector.load %arg11[%c0_22, %c0_23] : memref<1x128xf32, #tpu.memory_space<vmem>>, vector<1x128xf32>
    %cst_24 = arith.constant dense<0.000000e+00> : vector<8x128xf32>
    %23 = tpu.matmul %20, %21, %cst_24 {dimension_numbers = #tpu.dot_dimension_numbers<[1], [0], [0], [1], [0, 0, 1, 1], [], []>} : vector<8x128xf32>, vector<128x128xf32>, vector<8x128xf32> -> vector<8x128xf32>
    %24 = vector.broadcast %22 : vector<1x128xf32> to vector<8x128xf32>
    %25 = arith.addf %23, %24 : vector<8x128xf32>
    %c0_25 = arith.constant 0 : index
    %c0_26 = arith.constant 0 : index
    %26 = vector.load %arg12[%c0_25, %c0_26] : memref<128x128xf32, #tpu.memory_space<vmem>>, vector<128x128xf32>
    %c0_27 = arith.constant 0 : index
    %c0_28 = arith.constant 0 : index
    %27 = vector.load %arg13[%c0_27, %c0_28] : memref<1x128xf32, #tpu.memory_space<vmem>>, vector<1x128xf32>
    %cst_29 = arith.constant dense<0.000000e+00> : vector<8x128xf32>
    %28 = tpu.matmul %25, %26, %cst_29 {dimension_numbers = #tpu.dot_dimension_numbers<[1], [0], [0], [1], [0, 0, 1, 1], [], []>} : vector<8x128xf32>, vector<128x128xf32>, vector<8x128xf32> -> vector<8x128xf32>
    %29 = vector.broadcast %27 : vector<1x128xf32> to vector<8x128xf32>
    %30 = arith.addf %28, %29 : vector<8x128xf32>
    %c0_30 = arith.constant 0 : index
    %c0_31 = arith.constant 0 : index
    %31 = vector.load %arg14[%c0_30, %c0_31] : memref<8x128xf32, #tpu.memory_space<vmem>>, vector<8x128xf32>
    tpu.vector_store %arg14[%c0_30, %c0_31], %30 {strides = array<i32>} : memref<8x128xf32, #tpu.memory_space<vmem>>, vector<8x128xf32>,
    return
  }
  func.func @transform_0(%arg0: i32) -> (i32, i32) {
    %c0_i32 = arith.constant 0 : i32
    %c0_i32_0 = arith.constant 0 : i32
    return %arg0, %c0_i32 : i32, i32
  }
  func.func @transform_1(%arg0: i32) -> (i32, i32) {
    %c0_i32 = arith.constant 0 : i32
    %c0_i32_0 = arith.constant 0 : i32
    %c0_i32_1 = arith.constant 0 : i32
    return %c0_i32, %c0_i32_0 : i32, i32
  }
  func.func @transform_2(%arg0: i32) -> (i32, i32) {
    %c0_i32 = arith.constant 0 : i32
    %c0_i32_0 = arith.constant 0 : i32
    %c0_i32_1 = arith.constant 0 : i32
    return %c0_i32, %c0_i32_0 : i32, i32
  }
  func.func @transform_3(%arg0: i32) -> (i32, i32) {
    %c0_i32 = arith.constant 0 : i32
    %c0_i32_0 = arith.constant 0 : i32
    %c0_i32_1 = arith.constant 0 : i32
    return %c0_i32, %c0_i32_0 : i32, i32
  }
  func.func @transform_4(%arg0: i32) -> (i32, i32) {
    %c0_i32 = arith.constant 0 : i32
    %c0_i32_0 = arith.constant 0 : i32
    %c0_i32_1 = arith.constant 0 : i32
    return %c0_i32, %c0_i32_0 : i32, i32
  }
  func.func @transform_5(%arg0: i32) -> (i32, i32) {
    %c0_i32 = arith.constant 0 : i32
    %c0_i32_0 = arith.constant 0 : i32
    %c0_i32_1 = arith.constant 0 : i32
    return %c0_i32, %c0_i32_0 : i32, i32
  }
  func.func @transform_6(%arg0: i32) -> (i32, i32) {
    %c0_i32 = arith.constant 0 : i32
    %c0_i32_0 = arith.constant 0 : i32
    %c0_i32_1 = arith.constant 0 : i32
    return %c0_i32, %c0_i32_0 : i32, i32
  }
  func.func @transform_7(%arg0: i32) -> (i32, i32) {
    %c0_i32 = arith.constant 0 : i32
    %c0_i32_0 = arith.constant 0 : i32
    %c0_i32_1 = arith.constant 0 : i32
    return %c0_i32, %c0_i32_0 : i32, i32
  }
  func.func @transform_8(%arg0: i32) -> (i32, i32) {
    %c0_i32 = arith.constant 0 : i32
    %c0_i32_0 = arith.constant 0 : i32
    %c0_i32_1 = arith.constant 0 : i32
    return %c0_i32, %c0_i32_0 : i32, i32
  }
  func.func @transform_9(%arg0: i32) -> (i32, i32) {
    %c0_i32 = arith.constant 0 : i32
    %c0_i32_0 = arith.constant 0 : i32
    %c0_i32_1 = arith.constant 0 : i32
    return %c0_i32, %c0_i32_0 : i32, i32
  }
  func.func @transform_10(%arg0: i32) -> (i32, i32) {
    %c0_i32 = arith.constant 0 : i32
    %c0_i32_0 = arith.constant 0 : i32
    %c0_i32_1 = arith.constant 0 : i32
    return %c0_i32, %c0_i32_0 : i32, i32
  }
  func.func @transform_11(%arg0: i32) -> (i32, i32) {
    %c0_i32 = arith.constant 0 : i32
    %c0_i32_0 = arith.constant 0 : i32
    %c0_i32_1 = arith.constant 0 : i32
    return %c0_i32, %c0_i32_0 : i32, i32
  }
  func.func @transform_12(%arg0: i32) -> (i32, i32) {
    %c0_i32 = arith.constant 0 : i32
    %c0_i32_0 = arith.constant 0 : i32
    %c0_i32_1 = arith.constant 0 : i32
    return %c0_i32, %c0_i32_0 : i32, i32
  }
  func.func @transform_13(%arg0: i32) -> (i32, i32) {
    %c0_i32 = arith.constant 0 : i32
    %c0_i32_0 = arith.constant 0 : i32
    return %arg0, %c0_i32 : i32, i32
  }
}

module attributes {stable_mosaic.version = 11 : i64} {
  func.func @_autoencoder_kernel(%arg0: i32, %arg1: memref<8x32xf32, #tpu.memory_space<vmem>>, %arg2: memref<32x128xf32, #tpu.memory_space<vmem>>, %arg3: memref<1x128xf32, #tpu.memory_space<vmem>>, %arg4: memref<128x128xf32, #tpu.memory_space<vmem>>, %arg5: memref<1x128xf32, #tpu.memory_space<vmem>>, %arg6: memref<128x128xf32, #tpu.memory_space<vmem>>, %arg7: memref<1x128xf32, #tpu.memory_space<vmem>>, %arg8: memref<128x128xf32, #tpu.memory_space<vmem>>, %arg9: memref<1x128xf32, #tpu.memory_space<vmem>>, %arg10: memref<128x128xf32, #tpu.memory_space<vmem>>, %arg11: memref<1x128xf32, #tpu.memory_space<vmem>>, %arg12: memref<128x128xf32, #tpu.memory_space<vmem>>, %arg13: memref<1x128xf32, #tpu.memory_space<vmem>>, %arg14: memref<8x128xf32, #tpu.memory_space<vmem>>) attributes {dimension_semantics = [#tpu.dimension_semantics<parallel>], iteration_bounds = array<i64: 2>, scalar_prefetch = 0 : i64, scratch_operands = 0 : i64, tpu.core_type = #tpu.core_type<tc>, window_params = [{transform_indices = @transform_0, window_bounds = array<i64: 8, 32>}, {pipeline_mode = #tpu.pipeline_mode<synchronous>, transform_indices = @transform_1, window_bounds = array<i64: 32, 128>}, {pipeline_mode = #tpu.pipeline_mode<synchronous>, transform_indices = @transform_2, window_bounds = array<i64: 1, 128>}, {pipeline_mode = #tpu.pipeline_mode<synchronous>, transform_indices = @transform_3, window_bounds = array<i64: 128, 128>}, {pipeline_mode = #tpu.pipeline_mode<synchronous>, transform_indices = @transform_4, window_bounds = array<i64: 1, 128>}, {pipeline_mode = #tpu.pipeline_mode<synchronous>, transform_indices = @transform_5, window_bounds = array<i64: 128, 128>}, {pipeline_mode = #tpu.pipeline_mode<synchronous>, transform_indices = @transform_6, window_bounds = array<i64: 1, 128>}, {pipeline_mode = #tpu.pipeline_mode<synchronous>, transform_indices = @transform_7, window_bounds = array<i64: 128, 128>}, {pipeline_mode = #tpu.pipeline_mode<synchronous>, transform_indices = @transform_8, window_bounds = array<i64: 1, 128>}, {pipeline_mode = #tpu.pipeline_mode<synchronous>, transform_indices = @transform_9, window_bounds = array<i64: 128, 128>}, {pipeline_mode = #tpu.pipeline_mode<synchronous>, transform_indices = @transform_10, window_bounds = array<i64: 1, 128>}, {pipeline_mode = #tpu.pipeline_mode<synchronous>, transform_indices = @transform_11, window_bounds = array<i64: 128, 128>}, {pipeline_mode = #tpu.pipeline_mode<synchronous>, transform_indices = @transform_12, window_bounds = array<i64: 1, 128>}, {transform_indices = @transform_13, window_bounds = array<i64: 8, 128>}]} {
    %c0 = arith.constant 0 : index
    %c0_0 = arith.constant 0 : index
    %0 = vector.load %arg1[%c0, %c0_0] : memref<8x32xf32, #tpu.memory_space<vmem>>, vector<8x32xf32>
    %c0_1 = arith.constant 0 : index
    %c0_2 = arith.constant 0 : index
    %1 = vector.load %arg2[%c0_1, %c0_2] : memref<32x128xf32, #tpu.memory_space<vmem>>, vector<32x128xf32>
    %c0_3 = arith.constant 0 : index
    %c0_4 = arith.constant 0 : index
    %2 = vector.load %arg3[%c0_3, %c0_4] : memref<1x128xf32, #tpu.memory_space<vmem>>, vector<1x128xf32>
    %cst = arith.constant dense<0.000000e+00> : vector<8x128xf32>
    %3 = tpu.matmul %0, %1, %cst {dimension_numbers = #tpu.dot_dimension_numbers<[1], [0], [0], [1], [0, 0, 1, 1], [], []>} : vector<8x32xf32>, vector<32x128xf32>, vector<8x128xf32> -> vector<8x128xf32>
    %4 = vector.broadcast %2 : vector<1x128xf32> to vector<8x128xf32>
    %5 = arith.addf %3, %4 : vector<8x128xf32>
    %c0_5 = arith.constant 0 : index
    %c0_6 = arith.constant 0 : index
    %6 = vector.load %arg4[%c0_5, %c0_6] : memref<128x128xf32, #tpu.memory_space<vmem>>, vector<128x128xf32>
    %c0_7 = arith.constant 0 : index
    %c0_8 = arith.constant 0 : index
    %7 = vector.load %arg5[%c0_7, %c0_8] : memref<1x128xf32, #tpu.memory_space<vmem>>, vector<1x128xf32>
    %cst_9 = arith.constant dense<0.000000e+00> : vector<8x128xf32>
    %8 = tpu.matmul %5, %6, %cst_9 {dimension_numbers = #tpu.dot_dimension_numbers<[1], [0], [0], [1], [0, 0, 1, 1], [], []>} : vector<8x128xf32>, vector<128x128xf32>, vector<8x128xf32> -> vector<8x128xf32>
    %9 = vector.broadcast %7 : vector<1x128xf32> to vector<8x128xf32>
    %10 = arith.addf %8, %9 : vector<8x128xf32>
    %c0_10 = arith.constant 0 : index
    %c0_11 = arith.constant 0 : index
    %11 = vector.load %arg6[%c0_10, %c0_11] : memref<128x128xf32, #tpu.memory_space<vmem>>, vector<128x128xf32>
    %c0_12 = arith.constant 0 : index
    %c0_13 = arith.constant 0 : index
    %12 = vector.load %arg7[%c0_12, %c0_13] : memref<1x128xf32, #tpu.memory_space<vmem>>, vector<1x128xf32>
    %cst_14 = arith.constant dense<0.000000e+00> : vector<8x128xf32>
    %13 = tpu.matmul %10, %11, %cst_14 {dimension_numbers = #tpu.dot_dimension_numbers<[1], [0], [0], [1], [0, 0, 1, 1], [], []>} : vector<8x128xf32>, vector<128x128xf32>, vector<8x128xf32> -> vector<8x128xf32>
    %14 = vector.broadcast %12 : vector<1x128xf32> to vector<8x128xf32>
    %15 = arith.addf %13, %14 : vector<8x128xf32>
    %c0_15 = arith.constant 0 : index
    %c0_16 = arith.constant 0 : index
    %16 = vector.load %arg8[%c0_15, %c0_16] : memref<128x128xf32, #tpu.memory_space<vmem>>, vector<128x128xf32>
    %c0_17 = arith.constant 0 : index
    %c0_18 = arith.constant 0 : index
    %17 = vector.load %arg9[%c0_17, %c0_18] : memref<1x128xf32, #tpu.memory_space<vmem>>, vector<1x128xf32>
    %cst_19 = arith.constant dense<0.000000e+00> : vector<8x128xf32>
    %18 = tpu.matmul %15, %16, %cst_19 {dimension_numbers = #tpu.dot_dimension_numbers<[1], [0], [0], [1], [0, 0, 1, 1], [], []>} : vector<8x128xf32>, vector<128x128xf32>, vector<8x128xf32> -> vector<8x128xf32>
    %19 = vector.broadcast %17 : vector<1x128xf32> to vector<8x128xf32>
    %20 = arith.addf %18, %19 : vector<8x128xf32>
    %c0_20 = arith.constant 0 : index
    %c0_21 = arith.constant 0 : index
    %21 = vector.load %arg10[%c0_20, %c0_21] : memref<128x128xf32, #tpu.memory_space<vmem>>, vector<128x128xf32>
    %c0_22 = arith.constant 0 : index
    %c0_23 = arith.constant 0 : index
    %22 = vector.load %arg11[%c0_22, %c0_23] : memref<1x128xf32, #tpu.memory_space<vmem>>, vector<1x128xf32>
    %cst_24 = arith.constant dense<0.000000e+00> : vector<8x128xf32>
    %23 = tpu.matmul %20, %21, %cst_24 {dimension_numbers = #tpu.dot_dimension_numbers<[1], [0], [0], [1], [0, 0, 1, 1], [], []>} : vector<8x128xf32>, vector<128x128xf32>, vector<8x128xf32> -> vector<8x128xf32>
    %24 = vector.broadcast %22 : vector<1x128xf32> to vector<8x128xf32>
    %25 = arith.addf %23, %24 : vector<8x128xf32>
    %c0_25 = arith.constant 0 : index
    %c0_26 = arith.constant 0 : index
    %26 = vector.load %arg12[%c0_25, %c0_26] : memref<128x128xf32, #tpu.memory_space<vmem>>, vector<128x128xf32>
    %c0_27 = arith.constant 0 : index
    %c0_28 = arith.constant 0 : index
    %27 = vector.load %arg13[%c0_27, %c0_28] : memref<1x128xf32, #tpu.memory_space<vmem>>, vector<1x128xf32>
    %cst_29 = arith.constant dense<0.000000e+00> : vector<8x128xf32>
    %28 = tpu.matmul %25, %26, %cst_29 {dimension_numbers = #tpu.dot_dimension_numbers<[1], [0], [0], [1], [0, 0, 1, 1], [], []>} : vector<8x128xf32>, vector<128x128xf32>, vector<8x128xf32> -> vector<8x128xf32>
    %29 = vector.broadcast %27 : vector<1x128xf32> to vector<8x128xf32>
    %30 = arith.addf %28, %29 : vector<8x128xf32>
    %c0_30 = arith.constant 0 : index
    %c0_31 = arith.constant 0 : index
    %31 = vector.load %arg14[%c0_30, %c0_31] : memref<8x128xf32, #tpu.memory_space<vmem>>, vector<8x128xf32>
    tpu.vector_store %arg14[%c0_30, %c0_31], %30 {strides = array<i32>} : memref<8x128xf32, #tpu.memory_space<vmem>>, vector<8x128xf32>,
    return
  }
  func.func @transform_0(%arg0: i32) -> (i32, i32) {
    %c0_i32 = arith.constant 0 : i32
    %c0_i32_0 = arith.constant 0 : i32
    return %arg0, %c0_i32 : i32, i32
  }
  func.func @transform_1(%arg0: i32) -> (i32, i32) {
    %c0_i32 = arith.constant 0 : i32
    %c0_i32_0 = arith.constant 0 : i32
    %c0_i32_1 = arith.constant 0 : i32
    return %c0_i32, %c0_i32_0 : i32, i32
  }
  func.func @transform_2(%arg0: i32) -> (i32, i32) {
    %c0_i32 = arith.constant 0 : i32
    %c0_i32_0 = arith.constant 0 : i32
    %c0_i32_1 = arith.constant 0 : i32
    return %c0_i32, %c0_i32_0 : i32, i32
  }
  func.func @transform_3(%arg0: i32) -> (i32, i32) {
    %c0_i32 = arith.constant 0 : i32
    %c0_i32_0 = arith.constant 0 : i32
    %c0_i32_1 = arith.constant 0 : i32
    return %c0_i32, %c0_i32_0 : i32, i32
  }
  func.func @transform_4(%arg0: i32) -> (i32, i32) {
    %c0_i32 = arith.constant 0 : i32
    %c0_i32_0 = arith.constant 0 : i32
    %c0_i32_1 = arith.constant 0 : i32
    return %c0_i32, %c0_i32_0 : i32, i32
  }
  func.func @transform_5(%arg0: i32) -> (i32, i32) {
    %c0_i32 = arith.constant 0 : i32
    %c0_i32_0 = arith.constant 0 : i32
    %c0_i32_1 = arith.constant 0 : i32
    return %c0_i32, %c0_i32_0 : i32, i32
  }
  func.func @transform_6(%arg0: i32) -> (i32, i32) {
    %c0_i32 = arith.constant 0 : i32
    %c0_i32_0 = arith.constant 0 : i32
    %c0_i32_1 = arith.constant 0 : i32
    return %c0_i32, %c0_i32_0 : i32, i32
  }
  func.func @transform_7(%arg0: i32) -> (i32, i32) {
    %c0_i32 = arith.constant 0 : i32
    %c0_i32_0 = arith.constant 0 : i32
    %c0_i32_1 = arith.constant 0 : i32
    return %c0_i32, %c0_i32_0 : i32, i32
  }
  func.func @transform_8(%arg0: i32) -> (i32, i32) {
    %c0_i32 = arith.constant 0 : i32
    %c0_i32_0 = arith.constant 0 : i32
    %c0_i32_1 = arith.constant 0 : i32
    return %c0_i32, %c0_i32_0 : i32, i32
  }
  func.func @transform_9(%arg0: i32) -> (i32, i32) {
    %c0_i32 = arith.constant 0 : i32
    %c0_i32_0 = arith.constant 0 : i32
    %c0_i32_1 = arith.constant 0 : i32
    return %c0_i32, %c0_i32_0 : i32, i32
  }
  func.func @transform_10(%arg0: i32) -> (i32, i32) {
    %c0_i32 = arith.constant 0 : i32
    %c0_i32_0 = arith.constant 0 : i32
    %c0_i32_1 = arith.constant 0 : i32
    return %c0_i32, %c0_i32_0 : i32, i32
  }
  func.func @transform_11(%arg0: i32) -> (i32, i32) {
    %c0_i32 = arith.constant 0 : i32
    %c0_i32_0 = arith.constant 0 : i32
    %c0_i32_1 = arith.constant 0 : i32
    return %c0_i32, %c0_i32_0 : i32, i32
  }
  func.func @transform_12(%arg0: i32) -> (i32, i32) {
    %c0_i32 = arith.constant 0 : i32
    %c0_i32_0 = arith.constant 0 : i32
    %c0_i32_1 = arith.constant 0 : i32
    return %c0_i32, %c0_i32_0 : i32, i32
  }
  func.func @transform_13(%arg0: i32) -> (i32, i32) {
    %c0_i32 = arith.constant 0 : i32
    %c0_i32_0 = arith.constant 0 : i32
    return %arg0, %c0_i32 : i32, i32
  }
}

</mosaic_0001>

<bundles_post_ra>
// kernel: tpu_custom_call.1
= control target key start
LH: loop header
LB: loop body
LE: loop exit
PB: predicated region body
PF: predicated region fallthrough
CT: control target
= control target key end

     0   :  { %s2559_s0 = inlined_call_operand.hbm [shape: f32[16,32], index: 0, kind: input, shape index: {}]   ;;  %s2560_s1 = inlined_call_operand.hbm [shape: f32[32,128], index: 1, kind: input, shape index: {}]   ;;  %s2561_s2 = inlined_call_operand.vmem [shape: f32[1,128], index: 2, kind: input, shape index: {}]   ;;  %s2562_s3 = inlined_call_operand.hbm [shape: f32[128,128], index: 3, kind: input, shape index: {}]   ;;  %s2563_s4 = inlined_call_operand.vmem [shape: f32[1,128], index: 4, kind: input, shape index: {}]   ;;  %s2564_s5 = inlined_call_operand.hbm [shape: f32[128,128], index: 5, kind: input, shape index: {}]   ;;  %s2565_s6 = inlined_call_operand.vmem [shape: f32[1,128], index: 6, kind: input, shape index: {}]   ;;  %s2566_s7 = inlined_call_operand.hbm [shape: f32[128,128], index: 7, kind: input, shape index: {}]   ;;  %s2567_s8 = inlined_call_operand.vmem [shape: f32[1,128], index: 8, kind: input, shape index: {}]   ;;  %s2568_s9 = inlined_call_operand.hbm [shape: f32[128,128], index: 9, kind: input, shape index: {}]   ;;  %s2569_s10 = inlined_call_operand.vmem [shape: f32[1,128], index: 10, kind: input, shape index: {}]   ;;  %s2570_s11 = inlined_call_operand.hbm [shape: f32[128,128], index: 11, kind: input, shape index: {}]   ;;  %s2571_s12 = inlined_call_operand.vmem [shape: f32[1,128], index: 12, kind: input, shape index: {}]   ;;  %s2572_s13 = inlined_call_operand.hbm [shape: f32[16,128], index: 13, kind: output, shape index: {}]  }
   0x1   :  { %2577 = sst [smem:[#allocation20_spill]] %s2560_s1 }
   0x2   :  { %2578 = sst [smem:[#allocation21_spill]] %s2565_s6 }
   0x3   :  { %2579 = sst [smem:[#allocation22_spill]] %s2567_s8 }
   0x4   :  { %2580 = sst [smem:[#allocation23_spill]] %s2569_s10 }
   0x5   :  { %2581 = sst [smem:[#allocation24_spill]] %s2571_s12 }
   0x6   :  { %2582 = sst [smem:[#allocation25_spill]] %s2572_s13 }
   0x7   :  { %18 = vsyncpa [#allocation3], 0 }
   0x8   :  { %20 = vsyncpa [#allocation3 + $0x1], 0 }
   0x9   :  { %21 = vsyncpa [#allocation6], 0 }
   0xa   :  { %22 = vsyncpa [#allocation9], 0 }
   0xb   :  { %23 = vsyncpa [#allocation12], 0 }
   0xc   :  { %24 = vsyncpa [#allocation4], 0 }
   0xd   :  { %26 = vsyncpa [#allocation4 + $0x1], 0  ;;  %s2142_s25 = smov 0   ;;  %s2144_s26 = smov 0  }
   0xe   :  { %s2146_s27 = smov 0   ;;  %s2148_s28 = smov 0  }
   0xf LB: > { %s2059_s29 = smov [#allocation5]   ;;  %s2163_s14 = sadd.s32 4294967295, %s2057_s28   ;;  %s2057_s28 = sphi %s2148_s28, %s2611_s28   ;;  %s2053_s27 = sphi %s2146_s27, %s2610_s27   ;;  %s2049_s26 = sphi %s2144_s26, %s2609_s26   ;;  %s2045_s25 = sphi %s2142_s25, %s2608_s25  }
  0x10   : > { %s353_s30 = sshll.u32 %s2059_s29, 4  ;;  %p1237_p0 = scmp.ge.s32.totalorder %s2057_s28, 1  ;;  %s2168_s30 = int_to_ptr.vmem [resolvable:$true] %s353_s30 }
  0x11   : > { %p2574_p1 = scmp.eq.s32.totalorder %s2163_s14, 0  ;;  %p341_p2 = scmp.lt.s32.totalorder %s2057_s28, 3 }
  0x12   : > { %s2060_s16 = smov [#allocation8]   ;;  %s2061_s19 = smov [#allocation11]  }
  0x13   : > { %p2170_p3 = pnand %p1237_p0, %p341_p2  ;;  %s385_s17 = sshll.u32 %s2060_s16, 4  ;;  %s2183_s17 = int_to_ptr.vmem [resolvable:$true] %s385_s17 }
  0x14   : > { %s417_s20 = sshll.u32 %s2061_s19, 4  ;;  %s2585_s1 = sld [smem:[#allocation20_spill]]  ;;  %s2185_s20 = int_to_ptr.vmem [resolvable:$true] %s417_s20 }
  0x15   : > { %s2583_s15 = scalar_select %p2170_p3, 1, 0 }
  0x16   : > { %p1697_p5 = pneg %p2170_p3 }
  0x18   : > { %p2179_p6 = pnand %p1697_p5, %p2574_p1 }
  0x1a   : > { %s1781_s23 = scalar_lea.hbm %s2585_s1, 512  ;;  %p2195_p8 = pneg %p2179_p6 }
  0x1b   : > { %p1782_p7 = scmp.ne.s32.totalorder %s2585_s1, %s1781_s23  ;;  %p1788_p11 = scmp.lt.u32.totalorder %s1781_s23, %s2585_s1 }
  0x1d   : > { %p1784_p9 = pnand %p2195_p8, %p1782_p7 }
  0x1f   : > { %p1785_p10 = pneg %p1784_p9 }
  0x21   : > { %p1790_p12 = pnand %p1788_p11, %p1785_p10 }
  0x23   : > { %1793 = shalt.err (!%p1790_p12)
}
  0x24   : > { %s1794_s21 = scalar_lea.vmem %s2168_s30, 512  ;;  %p1802_p5 = scmp.lt.s32.totalorder %s2168_s30, %s2168_s30 }
  0x25   : > { %p1795_p13 = scmp.ne.s32.totalorder %s2168_s30, %s1794_s21  ;;  %p1803_p4 = scmp.lt.s32.totalorder %s1794_s21, %s1794_s21 }
  0x27   : > { %p1797_p0 = pnand %p1795_p13, %p2195_p8  ;;  %p1804_p7 = por %p1803_p4, %p1802_p5 }
  0x29   : > { %p1798_p2 = pneg %p1797_p0 }
  0x2b   : > { %p1805_p9 = pnand %p1804_p7, %p1798_p2 }
  0x2d   : > { %1808 = shalt.err (!%p1805_p9)
}
  0x2e   : > { %s2062_s22 = smov 128   ;;  %s2063_s13 = smov 8  }
  0x2f   : > { %1700 = dma.hbm_to_vmem [thread:$0]  (!%p2179_p6), %s2585_s1, 512, %s2168_s30, [#allocation6], %s2062_s22, %s2062_s22, %s2063_s13  }
  0x30   : > { %s1809_s21 = scalar_lea.hbm %s2564_s5, 2048 }
  0x31   : > { %p1810_p4 = scmp.ne.s32.totalorder %s2564_s5, %s1809_s21  ;;  %p1816_p12 = scmp.lt.u32.totalorder %s1809_s21, %s2564_s5 }
  0x33   : > { %p1812_p10 = pnand %p1810_p4, %p2195_p8 }
  0x35   : > { %p1813_p11 = pneg %p1812_p10 }
  0x37   : > { %p1818_p13 = pnand %p1816_p12, %p1813_p11 }
  0x39   : > { %1821 = shalt.err (!%p1818_p13)
}
  0x3a   : > { %s1822_s30 = scalar_lea.vmem %s2183_s17, 2048  ;;  %p1830_p7 = scmp.lt.s32.totalorder %s2183_s17, %s2183_s17 }
  0x3b   : > { %p1823_p0 = scmp.ne.s32.totalorder %s2183_s17, %s1822_s30  ;;  %p1831_p9 = scmp.lt.s32.totalorder %s1822_s30, %s1822_s30 }
  0x3d   : > { %p1825_p2 = pnand %p1823_p0, %p2195_p8  ;;  %p1832_p4 = por %p1831_p9, %p1830_p7 }
  0x3f   : > { %p1826_p5 = pneg %p1825_p2 }
  0x41   : > { %p1833_p10 = pnand %p1832_p4, %p1826_p5 }
  0x43   : > { %1836 = shalt.err (!%p1833_p10)
}
  0x44   : > { %1706 = dma.hbm_to_vmem [thread:$0]  (!%p2179_p6), %s2564_s5, 2048, %s2183_s17, [#allocation9], %s2062_s22, %s2062_s22, %s2063_s13  }
  0x45   : > { %s1837_s23 = scalar_lea.hbm %s2568_s9, 2048 }
  0x46   : > { %p1838_p11 = scmp.ne.s32.totalorder %s2568_s9, %s1837_s23  ;;  %p1844_p0 = scmp.lt.u32.totalorder %s1837_s23, %s2568_s9 }
  0x48   : > { %p1840_p12 = pnand %p1838_p11, %p2195_p8 }
  0x4a   : > { %p1841_p13 = pneg %p1840_p12 }
  0x4c   : > { %p1846_p2 = pnand %p1844_p0, %p1841_p13 }
  0x4e   : > { %1849 = shalt.err (!%p1846_p2)
}
  0x4f   : > { %s1850_s17 = scalar_lea.vmem %s2185_s20, 2048  ;;  %p1858_p4 = scmp.lt.s32.totalorder %s2185_s20, %s2185_s20 }
  0x50   : > { %p1851_p5 = scmp.ne.s32.totalorder %s2185_s20, %s1850_s17  ;;  %p1859_p10 = scmp.lt.s32.totalorder %s1850_s17, %s1850_s17 }
  0x52   : > { %p1853_p7 = pnand %p1851_p5, %p2195_p8  ;;  %p1860_p11 = por %p1859_p10, %p1858_p4 }
  0x54   : > { %p1854_p9 = pneg %p1853_p7 }
  0x56   : > { %p1861_p12 = pnand %p1860_p11, %p1854_p9 }
  0x58   : > { %1864 = shalt.err (!%p1861_p12)
}
  0x59   : > { %1712 = dma.hbm_to_vmem [thread:$0]  (!%p2179_p6), %s2568_s9, 2048, %s2185_s20, [#allocation12], %s2062_s22, %s2062_s22, %s2063_s13  }
  0x5a   : > { %s2064_s8 = smov [#allocation7]   ;;  %s2065_s12 = smov [#allocation10]  }
  0x5b   : > { %s369_s10 = sshll.u32 %s2064_s8, 4  ;;  %s401_s23 = sshll.u32 %s2065_s12, 4  ;;  %s370_s10 = int_to_ptr.vmem [resolvable:$true] %s369_s10  ;;  %s402_s23 = int_to_ptr.vmem [resolvable:$true] %s401_s23 }
  0x5c   : > { %s1865_s19 = scalar_lea.hbm %s2562_s3, 2048 }
  0x5d   : > { %p1866_p13 = scmp.ne.s32.totalorder %s2562_s3, %s1865_s19  ;;  %p1872_p5 = scmp.lt.u32.totalorder %s1865_s19, %s2562_s3 }
  0x5f   : > { %p1868_p0 = pnand %p1866_p13, %p2195_p8 }
  0x61   : > { %p1869_p2 = pneg %p1868_p0 }
  0x63   : > { %p1874_p7 = pnand %p1872_p5, %p1869_p2 }
  0x65   : > { %1877 = shalt.err (!%p1874_p7)
}
  0x66   : > { %s1878_s20 = scalar_lea.vmem %s370_s10, 2048  ;;  %p1886_p11 = scmp.lt.s32.totalorder %s370_s10, %s370_s10 }
  0x67   : > { %p1879_p9 = scmp.ne.s32.totalorder %s370_s10, %s1878_s20  ;;  %p1887_p12 = scmp.lt.s32.totalorder %s1878_s20, %s1878_s20 }
  0x69   : > { %p1881_p4 = pnand %p1879_p9, %p2195_p8  ;;  %p1888_p1 = por %p1887_p12, %p1886_p11 }
  0x6b   : > { %p1882_p10 = pneg %p1881_p4 }
  0x6d   : > { %p1889_p3 = pnand %p1888_p1, %p1882_p10 }
  0x6f   : > { %1892 = shalt.err (!%p1889_p3)
}
  0x70   : > { %1703 = dma.hbm_to_vmem [thread:$0]  (!%p2179_p6), %s2562_s3, 2048, %s370_s10, [#allocation6], %s2062_s22, %s2062_s22, %s2063_s13  }
  0x71   : > { %s1893_s24 = scalar_lea.hbm %s2566_s7, 2048 }
  0x72   : > { %p1894_p1 = scmp.ne.s32.totalorder %s2566_s7, %s1893_s24  ;;  %p1900_p0 = scmp.lt.u32.totalorder %s1893_s24, %s2566_s7 }
  0x74   : > { %p1896_p3 = pnand %p1894_p1, %p2195_p8 }
  0x76   : > { %p1897_p13 = pneg %p1896_p3 }
  0x78   : > { %p1902_p2 = pnand %p1900_p0, %p1897_p13 }
  0x7a   : > { %1905 = shalt.err (!%p1902_p2)
}
  0x7b   : > { %s1906_s30 = scalar_lea.vmem %s402_s23, 2048  ;;  %p1914_p4 = scmp.lt.s32.totalorder %s402_s23, %s402_s23 }
  0x7c   : > { %p1907_p5 = scmp.ne.s32.totalorder %s402_s23, %s1906_s30  ;;  %p1915_p10 = scmp.lt.s32.totalorder %s1906_s30, %s1906_s30 }
  0x7e   : > { %p1909_p7 = pnand %p1907_p5, %p2195_p8  ;;  %p1916_p11 = por %p1915_p10, %p1914_p4 }
  0x80   : > { %p1910_p9 = pneg %p1909_p7 }
  0x82   : > { %p1917_p12 = pnand %p1916_p11, %p1910_p9 }
  0x84   : > { %1920 = shalt.err (!%p1917_p12)
}
  0x85   : > { %1709 = dma.hbm_to_vmem [thread:$0]  (!%p2179_p6), %s2566_s7, 2048, %s402_s23, [#allocation9], %s2062_s22, %s2062_s22, %s2063_s13  }
  0x86   : > { %s2066_s1 = smov [#allocation13]   ;;  %s1921_s24 = scalar_lea.hbm %s2570_s11, 2048 }
  0x87   : > { %s433_s6 = sshll.u32 %s2066_s1, 4  ;;  %p1922_p1 = scmp.ne.s32.totalorder %s2570_s11, %s1921_s24  ;;  %s434_s6 = int_to_ptr.vmem [resolvable:$true] %s433_s6 }
  0x88   : > { %p1928_p0 = scmp.lt.u32.totalorder %s1921_s24, %s2570_s11 }
  0x89   : > { %p1924_p3 = pnand %p1922_p1, %p2195_p8 }
  0x8b   : > { %p1925_p13 = pneg %p1924_p3 }
  0x8d   : > { %p1930_p2 = pnand %p1928_p0, %p1925_p13 }
  0x8f   : > { %1933 = shalt.err (!%p1930_p2)
}
  0x90   : > { %s1934_s23 = scalar_lea.vmem %s434_s6, 2048  ;;  %p1942_p4 = scmp.lt.s32.totalorder %s434_s6, %s434_s6 }
  0x91   : > { %p1935_p5 = scmp.ne.s32.totalorder %s434_s6, %s1934_s23  ;;  %p1943_p10 = scmp.lt.s32.totalorder %s1934_s23, %s1934_s23 }
  0x93   : > { %p1937_p7 = pnand %p1935_p5, %p2195_p8  ;;  %p1944_p11 = por %p1943_p10, %p1942_p4 }
  0x95   : > { %p1938_p9 = pneg %p1937_p7 }
  0x97   : > { %p1945_p12 = pnand %p1944_p11, %p1938_p9 }
  0x99   : > { %1948 = shalt.err (!%p1945_p12)
}
  0x9a   : > { %1715 = dma.hbm_to_vmem [thread:$0]  (!%p2179_p6), %s2570_s11, 2048, %s434_s6, [#allocation12], %s2062_s22, %s2062_s22, %s2063_s13  }
  0x9b   : > { %s1236_s18 = sadd.s32 4294967294, %s2057_s28   ;;  %s2336_s16 = sadd.s32 1, %s2057_s28  }
  0x9c   : > { %s36_s20 = ssub.s32 %s2057_s28, %s2336_s16  ;;  %s39_s1 = sadd.s32 1, %s2053_s27 }
  0x9d   : > { %p37_p8 = scmp.eq.s32.totalorder %s36_s20, 0  ;;  %p46_p1 = scmp.ne.s32.totalorder %s2053_s27, %s2049_s26 }
  0x9e   : > { %p47_p3 = scmp.eq.s32.totalorder %s2057_s28, 0  ;;  %p52_p13 = scmp.ne.s32.totalorder %s2049_s26, %s2045_s25 }
  0x9f   : > { %s2347_s8 = scalar_select %p37_p8, %s2053_s27, %s39_s1  }
  0xa0   : > { %p2349_p0 = por %p47_p3, %p46_p1  ;;  %p2588_p2 = scmp.eq.s32.totalorder %s2163_s14, 0 }
  0xa1   : > { %p328_p5 = scmp.eq.s32.totalorder %s2163_s14, 1  ;;  %p334_p7 = scmp.eq.s32.totalorder %s1236_s18, 1 }
  0xa2   : > { %p2355_p6 = por %p2588_p2, %p52_p13  ;;  %p1730_p9 = scmp.lt.s32.totalorder %s2057_s28, 2 }
  0xa3   : > { %s450_s13 = sand.u32 1, %s2053_s27   ;;  %p2362_p4 = por %p328_p5, %p46_p1 }
  0xa4   : > { %p2366_p10 = por %p334_p7, %p52_p13  ;;  %s1245_s29 = sshll.u32 %s450_s13, 3 }
  0xa5   : > { %s2590_s6 = scalar_select %p2362_p4, 1, 0 }
  0xa6   : > { %s2591_s24 = scalar_select %p2366_p10, 1, 0 }
  0xa7   : > { %s1246_s19 = sshll.u32 %s2057_s28, 7  ;;  %s454_s30 = scalar_lea.vmem [#allocation2], %s1245_s29 }
  0xa8   : > { %s2374_s23 = scalar_lea.hbm %s2559_s0, %s1246_s19  ;;  %s461_s10 = sshll.u32 %s454_s30, 4  ;;  %s2376_s10 = int_to_ptr.vmem [resolvable:$true] %s461_s10 }
  0xa9   : > { %p2380_p11 = pnand %p1730_p9, %p2349_p0  ;;  %s451_s20 = scalar_lea.sflag [#allocation3], %s450_s13 }
  0xaa   : > { %s1949_s1 = scalar_lea.hbm %s2374_s23, 128  ;;  %s1954_s21 = scalar_lea.hbm %s2559_s0, 256 }
  0xab   : > { %p1950_p12 = scmp.ne.s32.totalorder %s2374_s23, %s1949_s1  ;;  %p1951_p8 = pneg %p2380_p11 }
  0xac   : > { %p1955_p13 = scmp.lt.u32.totalorder %s2374_s23, %s2559_s0  ;;  %p1956_p0 = scmp.lt.u32.totalorder %s1954_s21, %s1949_s1 }
  0xad   : > { %p1952_p1 = pnand %p1951_p8, %p1950_p12  ;;  %p1958_p5 = scmp.lt.u32.totalorder %s1949_s1, %s2374_s23 }
  0xae   : > { %p1957_p2 = por %p1956_p0, %p1955_p13 }
  0xaf   : > { %p1953_p3 = pneg %p1952_p1 }
  0xb0   : > { %p1959_p7 = por %p1958_p5, %p1957_p2 }
  0xb2   : > { %p1960_p9 = pnand %p1959_p7, %p1953_p3 }
  0xb4   : > { %1963 = shalt.err (!%p1960_p9)
}
  0xb5   : > { %s1964_s13 = scalar_lea.vmem %s2376_s10, 128  ;;  %s2067_s30 = smov [#allocation2]  }
  0xb6   : > { %p1965_p12 = scmp.ne.s32.totalorder %s2376_s10, %s1964_s13  ;;  %s1969_s29 = sshll.u32 %s2067_s30, 4  ;;  %s1970_s29 = int_to_ptr.vmem [resolvable:$false] %s1969_s29 }
  0xb7   : > { %s1971_s19 = scalar_lea.vmem %s1970_s29, 256  ;;  %p1972_p4 = scmp.lt.s32.totalorder %s2376_s10, %s1970_s29 }
  0xb8   : > { %p1967_p1 = pnand %p1965_p12, %p1951_p8  ;;  %p1973_p13 = scmp.lt.s32.totalorder %s1971_s19, %s1964_s13 }
  0xba   : > { %p1968_p10 = pneg %p1967_p1  ;;  %p1974_p0 = por %p1973_p13, %p1972_p4 }
  0xbc   : > { %p1975_p2 = pnand %p1974_p0, %p1968_p10 }
  0xbe   : > { %1978 = shalt.err (!%p1975_p2)
}
  0xbf   : > { %1719 = dma.hbm_to_vmem [thread:$0]  (!%p2380_p11), %s2374_s23, 128, %s2376_s10, %s451_s20  }
  0xc0   : > { %p2593_p3 = scmp.ne.s32.totalorder %s2583_s15, 0 }
  0xc1   : > { %s2412_s1 = sand.u32 (!%p2593_p3), 1, %s2049_s26  }
  0xc2   : > { %470 = sbr.rel (%p2593_p3) target bundleno = 1519 (0x5ef), region = 72  ;;  %s1248_s21 = sshll.u32 (!%p2593_p3), %s2412_s1, 3 }
  0xc3   : > { %s473_s12 = scalar_lea.sflag (!%p2593_p3), [#allocation3], %s2412_s1  ;;  %s2418_s17 = scalar_lea.vmem (!%p2593_p3), [#allocation2], %s1248_s21 }
  0xc9   : > { %2024 = dma.done.wait (%p2355_p6), %s473_s12, 128  }
  0xca   : > { %2026 = vsyncadd (%p2355_p6), %s473_s12, 4294967168  ;;  %p2594_p4 = scmp.eq.s32.totalorder %s2163_s14, 0 }
  0xcc   : > { %2028 = dma.done.wait (%p2594_p4), [#allocation6], 2560   ;;  %p2595_p10 = pmov %p2594_p4 }
  0xcd   : > { %p2596_p11 = pmov %p2594_p4 }
  0xce   : > { %2030 = vsyncadd (%p2595_p10), [#allocation6], 4294964736 }
  0xcf   : > { %2032 = dma.done.wait (%p2596_p11), [#allocation9], 4096   ;;  %p2597_p8 = pmov %p2594_p4 }
  0xd0   : > { %p2598_p5 = pmov %p2594_p4 }
  0xd1   : > { %2034 = vsyncadd (%p2597_p8), [#allocation9], 4294963200 }
  0xd2   : > { %2036 = dma.done.wait (%p2598_p5), [#allocation12], 4096   ;;  %p2599_p7 = pmov %p2594_p4 }
  0xd3   : > { %v2068_v0 = vmov 0.0|0.0   ;;  %vm2069_vm0 = vmmov 0   ;;  %v2070_v1 = vmov 0.0   ;;  %v544_v2 = vld [vmem:[#allocation5] sm:$0xff]  ;;  %v545_v3 = vld [vmem:[#allocation5 + $0x8] sm:$0xff]  ;;  %v546_v4 = vld [vmem:[#allocation5 + $0x10] sm:$0xff] }
  0xd4   : > { %2038 = vsyncadd (%p2599_p7), [#allocation12], 4294963200  ;;  %1543 = vmatprep.subr.bf16.mxu0 %v2068_v0  ;;  %1365 = vmatprep.mubr.msk.f32.mxu0 %vm2069_vm0, %v2070_v1  ;;  %v1544_v5 = vpack.c.bf16 %v545_v3, %v544_v2  ;;  %v547_v6 = vld [vmem:[#allocation5 + $0x18] sm:$0xff]  ;;  %v629_v7 = vld [vmem:[#allocation7] sm:$0xff]  ;;  %vm555_vm1 = vcmask 261120   ;;  %s2600_s13 = sld [smem:[#allocation21_spill]] }
  0xd5   : > { %1549 = vmatprep.subr.bf16.mxu1 %v2068_v0  ;;  %1400 = vmatprep.mubr.msk.f32.mxu1 %vm2069_vm0, %v2070_v1  ;;  %v630_v8 = vld [vmem:[#allocation7 + $0x8] sm:$0xff]  ;;  %v631_v9 = vld [vmem:[#allocation7 + $0x10] sm:$0xff]  ;;  %v632_v10 = vld [vmem:[#allocation7 + $0x18] sm:$0xff]  ;;  %v1547_v11 = vpack.c.bf16 %v547_v6, %v546_v4  ;;  %s2601_s19 = sld [smem:[#allocation22_spill]]  ;;  %s2602_s15 = sld [smem:[#allocation23_spill]] }
  0xd6   : > { %1545 = vmatpush3.bf16.msra.mxu0 %v1544_v5  ;;  %v1550_v12 = vpack.c.bf16 %v630_v8, %v629_v7  ;;  %v1553_v13 = vpack.c.bf16 %v632_v10, %v631_v9  ;;  %v633_v14 = vld [vmem:[#allocation7 + $0x20] sm:$0xff]  ;;  %v634_v15 = vld [vmem:[#allocation7 + $0x28] sm:$0xff]  ;;  %v543_v16 = vld [vmem:[%s2418_s17] sm:$0xff]  ;;  %s2603_s10 = sld [smem:[#allocation24_spill]]  ;;  %s1264_s18 = sshll.u32 %s2163_s14, 7 }
  0xd7   : > { %1546 = vmatprep.subr.bf16.mxu0 %v2068_v0  ;;  %v1556_v17 = vpack.c.bf16 %v634_v15, %v633_v14  ;;  %v635_v18 = vld [vmem:[#allocation7 + $0x30] sm:$0xff]  ;;  %v636_v19 = vld [vmem:[#allocation7 + $0x38] sm:$0xff]  ;;  %v637_v21 = vld [vmem:[#allocation7 + $0x40] sm:$0xff]  ;;  %s542_s20 = scalar_lea.vmem [#allocation14], %s1248_s21  ;;  %s1096_s17 = scalar_lea.sflag [#allocation4], %s2412_s1 }
  0xd8   : > { %1551 = vmatpush3.bf16.msra.mxu1 %v1550_v12  ;;  %v1559_v20 = vpack.c.bf16 %v636_v19, %v635_v18  ;;  %v638_v22 = vld [vmem:[#allocation7 + $0x48] sm:$0xff]  ;;  %v639_v24 = vld [vmem:[#allocation7 + $0x50] sm:$0xff]  ;;  %v640_v25 = vld [vmem:[#allocation7 + $0x58] sm:$0xff]  ;;  %p2605_p9 = scmp.ne.s32.totalorder %s2590_s6, 0  ;;  %s2071_s14 = smov [#allocation14]  }
  0xd9   : > { %1552 = vmatprep.subr.bf16.mxu1 %v2068_v0  ;;  %v1562_v23 = vpack.c.bf16 %v638_v22, %v637_v21  ;;  %v1565_v26 = vpack.c.bf16 %v640_v25, %v639_v24  ;;  %v641_v27 = vld [vmem:[#allocation7 + $0x60] sm:$0xff]  ;;  %v642_v28 = vld [vmem:[#allocation7 + $0x68] sm:$0xff]  ;;  %v643_v30 = vld [vmem:[#allocation7 + $0x70] sm:$0xff]  ;;  %s1983_s21 = sshll.u32 %s2071_s14, 4  ;;  %s1984_s21 = int_to_ptr.vmem [resolvable:$false] %s1983_s21 }
  0xda   : > { %1548 = vmatpush3.bf16.msra.mxu0 %v1547_v11  ;;  %v1568_v29 = vpack.c.bf16 %v642_v28, %v641_v27  ;;  %v644_v31 = vld [vmem:[#allocation7 + $0x78] sm:$0xff]  ;;  %v722_v33 = vld [vmem:[#allocation8] sm:$0xff]  ;;  %v723_v34 = vld [vmem:[#allocation8 + $0x8] sm:$0xff]  ;;  %s1985_s22 = scalar_lea.vmem %s1984_s21, 256 }
  0xdb   : > { %1573 = vmatprep.subr.bf16.mxu0 %v2068_v0  ;;  %v1571_v32 = vpack.c.bf16 %v644_v31, %v643_v30  ;;  %v724_v35 = vld [vmem:[#allocation8 + $0x10] sm:$0xff]  ;;  %v1574_v36 = vpack.c.bf16 %v723_v34, %v722_v33  ;;  %v725_v37 = vld [vmem:[#allocation8 + $0x18] sm:$0xff]  ;;  %v726_v39 = vld [vmem:[#allocation8 + $0x20] sm:$0xff] }
  0xdc   : > { %1554 = vmatpush3.bf16.msra.mxu1 %v1553_v13  ;;  %v1577_v38 = vpack.c.bf16 %v725_v37, %v724_v35  ;;  %v727_v40 = vld [vmem:[#allocation8 + $0x28] sm:$0xff]  ;;  %v728_v42 = vld [vmem:[#allocation8 + $0x30] sm:$0xff]  ;;  %v729_v43 = vld [vmem:[#allocation8 + $0x38] sm:$0xff] }
  0xdd   : > { %1366 = vmatmul.mubr.msk.f32.vlgmr.msra.gmra.mrb[0].mxu0 %vm555_vm1, %v543_v16  ;;  %1555 = vmatprep.subr.bf16.mxu1 %v2068_v0  ;;  %v1580_v41 = vpack.c.bf16 %v727_v40, %v726_v39  ;;  %v1583_v44 = vpack.c.bf16 %v729_v43, %v728_v42  ;;  %v730_v45 = vld [vmem:[#allocation8 + $0x40] sm:$0xff]  ;;  %v731_v46 = vld [vmem:[#allocation8 + $0x48] sm:$0xff]  ;;  %v732_v48 = vld [vmem:[#allocation8 + $0x50] sm:$0xff] }
  0xde   : > { %1435 = vmatprep.mubr.msk.f32.mxu0 %vm2069_vm0, %v2070_v1  ;;  %1575 = vmatpush3.bf16.msra.mxu0 %v1574_v36  ;;  %v1586_v47 = vpack.c.bf16 %v731_v46, %v730_v45  ;;  %v733_v49 = vld [vmem:[#allocation8 + $0x58] sm:$0xff]  ;;  %v734_v51 = vld [vmem:[#allocation8 + $0x60] sm:$0xff]  ;;  %v735_v52 = vld [vmem:[#allocation8 + $0x68] sm:$0xff] }
  0xdf   : > { %1576 = vmatprep.subr.bf16.mxu0 %v2068_v0  ;;  %v1589_v50 = vpack.c.bf16 %v733_v49, %v732_v48  ;;  %v1592_v53 = vpack.c.bf16 %v735_v52, %v734_v51  ;;  %v1256_v54 = vld [vmem:[%s2561_s2] ss:$0 sm:$0xff]  ;;  %v737_v59 = vld [vmem:[#allocation8 + $0x78] sm:$0xff]  ;;  %v815_v61 = vld [vmem:[#allocation10] sm:$0xff] }
  0xe0   : > { %1557 = vmatpush3.bf16.msra.mxu1 %v1556_v17  ;;  %v736_v58 = vld [vmem:[#allocation8 + $0x70] sm:$0xff]  ;;  %v816_v62 = vld [vmem:[#allocation10 + $0x8] sm:$0xff]  ;;  %v818_v3 = vld [vmem:[#allocation10 + $0x18] sm:$0xff] }
  0xe1   : > { %1558 = vmatprep.subr.bf16.mxu1 %v2068_v0  ;;  %v1595_v60 = vpack.c.bf16 %v737_v59, %v736_v58  ;;  %v817_v63 = vld [vmem:[#allocation10 + $0x10] sm:$0xff]  ;;  %v1598_v2 = vpack.c.bf16 %v816_v62, %v815_v61  ;;  %v819_v5 = vld [vmem:[#allocation10 + $0x20] sm:$0xff]  ;;  %v820_v6 = vld [vmem:[#allocation10 + $0x28] sm:$0xff] }
  0xe2   : > { %1578 = vmatpush3.bf16.msra.mxu0 %v1577_v38  ;;  %v1601_v4 = vpack.c.bf16 %v818_v3, %v817_v63  ;;  %v1604_v7 = vpack.c.bf16 %v820_v6, %v819_v5  ;;  %v821_v8 = vld [vmem:[#allocation10 + $0x30] sm:$0xff]  ;;  %v822_v9 = vld [vmem:[#allocation10 + $0x38] sm:$0xff]  ;;  %v823_v11 = vld [vmem:[#allocation10 + $0x40] sm:$0xff] }
  0xe3   : > { %1579 = vmatprep.subr.bf16.mxu0 %v2068_v0  ;;  %v1607_v10 = vpack.c.bf16 %v822_v9, %v821_v8  ;;  %v824_v12 = vld [vmem:[#allocation10 + $0x48] sm:$0xff]  ;;  %v825_v14 = vld [vmem:[#allocation10 + $0x50] sm:$0xff]  ;;  %v826_v15 = vld [vmem:[#allocation10 + $0x58] sm:$0xff] }
  0xe4   : > { %1560 = vmatpush3.bf16.msra.mxu1 %v1559_v20  ;;  %v1610_v13 = vpack.c.bf16 %v824_v12, %v823_v11  ;;  %v1613_v16 = vpack.c.bf16 %v826_v15, %v825_v14  ;;  %v827_v17 = vld [vmem:[#allocation10 + $0x60] sm:$0xff]  ;;  %v828_v18 = vld [vmem:[#allocation10 + $0x68] sm:$0xff]  ;;  %v1258_v20 = vld [vmem:[%s2563_s4] ss:$0 sm:$0xff] }
  0xe5   : > { %1561 = vmatprep.subr.bf16.mxu1 %v2068_v0  ;;  %v1616_v19 = vpack.c.bf16 %v828_v18, %v827_v17  ;;  %v829_v24 = vld [vmem:[#allocation10 + $0x70] sm:$0xff]  ;;  %v830_v25 = vld [vmem:[#allocation10 + $0x78] sm:$0xff]  ;;  %v908_v27 = vld [vmem:[#allocation11] sm:$0xff] }
  0xe6   : > { %1581 = vmatpush3.bf16.msra.mxu0 %v1580_v41  ;;  %v909_v28 = vld [vmem:[#allocation11 + $0x8] sm:$0xff]  ;;  %v911_v31 = vld [vmem:[#allocation11 + $0x18] sm:$0xff]  ;;  %v912_v33 = vld [vmem:[#allocation11 + $0x20] sm:$0xff] }
  0xe7   : > { %1582 = vmatprep.subr.bf16.mxu0 %v2068_v0  ;;  %v1622_v30 = vpack.c.bf16 %v909_v28, %v908_v27  ;;  %v913_v34 = vld [vmem:[#allocation11 + $0x28] sm:$0xff]  ;;  %v914_v36 = vld [vmem:[#allocation11 + $0x30] sm:$0xff]  ;;  %v915_v37 = vld [vmem:[#allocation11 + $0x38] sm:$0xff] }
  0xe8   : > { %1563 = vmatpush3.bf16.msra.mxu1 %v1562_v23  ;;  %v1628_v35 = vpack.c.bf16 %v913_v34, %v912_v33  ;;  %v1631_v38 = vpack.c.bf16 %v915_v37, %v914_v36  ;;  %v916_v39 = vld [vmem:[#allocation11 + $0x40] sm:$0xff]  ;;  %v917_v40 = vld [vmem:[#allocation11 + $0x48] sm:$0xff]  ;;  %v918_v42 = vld [vmem:[#allocation11 + $0x50] sm:$0xff] }
  0xe9   : > { %1564 = vmatprep.subr.bf16.mxu1 %v2068_v0  ;;  %v1634_v41 = vpack.c.bf16 %v917_v40, %v916_v39  ;;  %v919_v43 = vld [vmem:[#allocation11 + $0x58] sm:$0xff]  ;;  %v920_v45 = vld [vmem:[#allocation11 + $0x60] sm:$0xff]  ;;  %v921_v46 = vld [vmem:[#allocation11 + $0x68] sm:$0xff] }
  0xea   : > { %1584 = vmatpush3.bf16.msra.mxu0 %v1583_v44  ;;  %v1637_v44 = vpack.c.bf16 %v919_v43, %v918_v42  ;;  %v1259_v48 = vld [vmem:[%s2600_s13] ss:$0 sm:$0xff]  ;;  %v1004_v59 = vld [vmem:[#allocation13 + $0x18] sm:$0xff]  ;;  %v1005_v61 = vld [vmem:[#allocation13 + $0x20] sm:$0xff]  ;;  %s1109_s13 = sshll.u32 %s542_s20, 4  ;;  %s2517_s13 = int_to_ptr.vmem [resolvable:$true] %s1109_s13 }
  0xeb   : > { %1585 = vmatprep.subr.bf16.mxu0 %v2068_v0  ;;  %v922_v52 = vld [vmem:[#allocation11 + $0x70] sm:$0xff]  ;;  %v1006_v62 = vld [vmem:[#allocation13 + $0x28] sm:$0xff]  ;;  %v1012_v8 = vld [vmem:[#allocation13 + $0x58] sm:$0xff]  ;;  %p1986_p13 = scmp.lt.s32.totalorder %s2517_s13, %s1984_s21 }
  0xec   : > { %1566 = vmatpush3.bf16.msra.mxu1 %v1565_v26  ;;  %v1619_v26 = vpack.c.bf16 %v830_v25, %v829_v24  ;;  %v1652_v63 = vpack.c.bf16 %v1006_v62, %v1005_v61  ;;  %v1010_v5 = vld [vmem:[#allocation13 + $0x48] sm:$0xff]  ;;  %v1015_v17 = vld [vmem:[#allocation13 + $0x70] sm:$0xff]  ;;  %v1016_v18 = vld [vmem:[#allocation13 + $0x78] sm:$0xff] }
  0xed   : > { %1567 = vmatprep.subr.bf16.mxu1 %v2068_v0  ;;  %v1014_v11 = vld [vmem:[#allocation13 + $0x68] sm:$0xff] }
  0xee   : > { %1587 = vmatpush3.bf16.msra.mxu0 %v1586_v47  ;;  %v1640_v47 = vpack.c.bf16 %v921_v46, %v920_v45 }
  0xef   : > { %1588 = vmatprep.subr.bf16.mxu0 %v2068_v0 }
  0xf0   : > { %1569 = vmatpush3.bf16.msra.mxu1 %v1568_v29  ;;  %v910_v29 = vld [vmem:[#allocation11 + $0x10] sm:$0xff] }
  0xf1   : > { %1570 = vmatprep.subr.bf16.mxu1 %v2068_v0 }
  0xf2   : > { %1590 = vmatpush3.bf16.msra.mxu0 %v1589_v50 }
  0xf3   : > { %1591 = vmatprep.subr.bf16.mxu0 %v2068_v0 }
  0xf4   : > { %1572 = vmatpush3.bf16.msra.mxu1 %v1571_v32  ;;  %v1625_v32 = vpack.c.bf16 %v911_v31, %v910_v29 }
  0xf5   : > { %1597 = vmatprep.subr.bf16.mxu1 %v2068_v0 }
  0xf6   : > { %1593 = vmatpush3.bf16.msra.mxu0 %v1592_v53  ;;  %v923_v53 = vld [vmem:[#allocation11 + $0x78] sm:$0xff] }
  0xf7   : > { %1594 = vmatprep.subr.bf16.mxu0 %v2068_v0 }
  0xfa   : > { %1596 = vmatpush3.bf16.msra.mxu0 %v1595_v60 }
  0xfb   : > { %1621 = vmatprep.subr.bf16.mxu0 %v2068_v0 }
 0x1b0   : > { %v625_v55 = vpop.f32.mrb[0].mxu0 }
 0x1b1   : > { %v626_v56 = vadd.f32 %v1256_v54, %v625_v55  ;;  %v1367_v57 = vpop.f32.mrb[1].mxu0  ;;  %v1643_v54 = vpack.c.bf16 %v923_v53, %v922_v52  ;;  %v1001_v55 = vld [vmem:[#allocation13] sm:$0xff] }
 0x1b2   : > { %v1003_v57 = vld [vmem:[#allocation13 + $0x10] sm:$0xff] }
 0x1b3   : > { %1401 = vmatmul.mubr.f32.vlgmr.msra.gmra.mrb[0].mxu1 %v626_v56  ;;  %v1002_v56 = vld [vmem:[#allocation13 + $0x8] sm:$0xff]  ;;  %v1649_v60 = vpack.c.bf16 %v1004_v59, %v1003_v57 }
 0x1b4   : > { %1470 = vmatprep.mubr.msk.f32.mxu1 %vm2069_vm0, %v2070_v1  ;;  %1599 = vmatpush3.bf16.msra.mxu1 %v1598_v2  ;;  %v1646_v58 = vpack.c.bf16 %v1002_v56, %v1001_v55  ;;  %v1008_v2 = vld [vmem:[#allocation13 + $0x38] sm:$0xff] }
 0x1b5   : > { %1600 = vmatprep.subr.bf16.mxu1 %v2068_v0 }
 0x1b8   : > { %1602 = vmatpush3.bf16.msra.mxu1 %v1601_v4  ;;  %v1009_v4 = vld [vmem:[#allocation13 + $0x40] sm:$0xff] }
 0x1b9   : > { %1603 = vmatprep.subr.bf16.mxu1 %v2068_v0  ;;  %v1658_v6 = vpack.c.bf16 %v1010_v5, %v1009_v4 }
 0x1bc   : > { %1605 = vmatpush3.bf16.msra.mxu1 %v1604_v7  ;;  %v1011_v7 = vld [vmem:[#allocation13 + $0x50] sm:$0xff] }
 0x1bd   : > { %1606 = vmatprep.subr.bf16.mxu1 %v2068_v0  ;;  %v1661_v9 = vpack.c.bf16 %v1012_v8, %v1011_v7 }
 0x1c0   : > { %1608 = vmatpush3.bf16.msra.mxu1 %v1607_v10  ;;  %v1013_v10 = vld [vmem:[#allocation13 + $0x60] sm:$0xff] }
 0x1c1   : > { %1609 = vmatprep.subr.bf16.mxu1 %v2068_v0  ;;  %v1664_v12 = vpack.c.bf16 %v1014_v11, %v1013_v10 }
 0x1c4   : > { %1611 = vmatpush3.bf16.msra.mxu1 %v1610_v13  ;;  %v1260_v13 = vld [vmem:[%s2601_s19] ss:$0 sm:$0xff]  ;;  %s2604_s19 = sld [smem:[#allocation25_spill]] }
 0x1c5   : > { %1612 = vmatprep.subr.bf16.mxu1 %v2068_v0 }
 0x1c8   : > { %1614 = vmatpush3.bf16.msra.mxu1 %v1613_v16 }
 0x1c9   : > { %1615 = vmatprep.subr.bf16.mxu1 %v2068_v0 }
 0x1ca   : > { %s2515_s12 = scalar_lea.hbm %s2604_s19, %s1264_s18 }
 0x1cc   : > { %1617 = vmatpush3.bf16.msra.mxu1 %v1616_v19  ;;  %v1667_v19 = vpack.c.bf16 %v1016_v18, %v1015_v17 }
 0x1cd   : > { %1618 = vmatprep.subr.bf16.mxu1 %v2068_v0 }
 0x1d0   : > { %1620 = vmatpush3.bf16.msra.mxu1 %v1619_v26 }
 0x1d1   : > { %1645 = vmatprep.subr.bf16.mxu1 %v2068_v0 }
 0x286   : > { %v718_v21 = vpop.f32.mrb[0].mxu1 }
 0x287   : > { %v719_v22 = vadd.f32 %v1258_v20, %v718_v21  ;;  %v1402_v23 = vpop.f32.mrb[1].mxu1  ;;  %v1261_v20 = vld [vmem:[%s2602_s15] ss:$0 sm:$0xff]  ;;  %s1979_s15 = scalar_lea.vmem %s2517_s13, 128 }
 0x288   : > { %v1262_v23 = vld [vmem:[%s2603_s10] ss:$0 sm:$0xff]  ;;  %p1980_p6 = scmp.ne.s32.totalorder %s2517_s13, %s1979_s15  ;;  %p1987_p0 = scmp.lt.s32.totalorder %s1985_s22, %s1979_s15 }
 0x289   : > { %1436 = vmatmul.mubr.f32.vlgmr.msra.gmra.mrb[2].mxu0 %v719_v22 }
 0x28a   : > { %1505 = vmatprep.mubr.msk.f32.mxu0 %vm2069_vm0, %v2070_v1  ;;  %1623 = vmatpush3.bf16.msra.mxu0 %v1622_v30  ;;  %p1981_p12 = pnand %p1980_p6, %p2605_p9  ;;  %p1988_p2 = por %p1987_p0, %p1986_p13 }
 0x28b   : > { %1624 = vmatprep.subr.bf16.mxu0 %v2068_v0 }
 0x28c   : > { %p1982_p1 = pneg %p1981_p12 }
 0x28e   : > { %1626 = vmatpush3.bf16.msra.mxu0 %v1625_v32  ;;  %p1989_p3 = pnand %p1988_p2, %p1982_p1 }
 0x28f   : > { %1627 = vmatprep.subr.bf16.mxu0 %v2068_v0 }
 0x292   : > { %1629 = vmatpush3.bf16.msra.mxu0 %v1628_v35 }
 0x293   : > { %1630 = vmatprep.subr.bf16.mxu0 %v2068_v0 }
 0x296   : > { %1632 = vmatpush3.bf16.msra.mxu0 %v1631_v38 }
 0x297   : > { %1633 = vmatprep.subr.bf16.mxu0 %v2068_v0 }
 0x29a   : > { %1635 = vmatpush3.bf16.msra.mxu0 %v1634_v41 }
 0x29b   : > { %1636 = vmatprep.subr.bf16.mxu0 %v2068_v0 }
 0x29e   : > { %1638 = vmatpush3.bf16.msra.mxu0 %v1637_v44 }
 0x29f   : > { %1639 = vmatprep.subr.bf16.mxu0 %v2068_v0 }
 0x2a2   : > { %1641 = vmatpush3.bf16.msra.mxu0 %v1640_v47 }
 0x2a3   : > { %1642 = vmatprep.subr.bf16.mxu0 %v2068_v0 }
 0x2a6   : > { %1644 = vmatpush3.bf16.msra.mxu0 %v1643_v54 }
 0x35c   : > { %v811_v49 = vpop.f32.mrb[2].mxu0 }
 0x35d   : > { %v812_v50 = vadd.f32 %v1259_v48, %v811_v49  ;;  %v1437_v51 = vpop.f32.mrb[3].mxu0 }
 0x35f   : > { %1471 = vmatmul.mubr.f32.vlgmr.msra.gmra.mrb[2].mxu1 %v812_v50 }
 0x360   : > { %1540 = vmatprep.mubr.msk.f32.mxu1 %vm2069_vm0, %v2070_v1  ;;  %1647 = vmatpush3.bf16.msra.mxu1 %v1646_v58  ;;  %v1007_v1 = vld [vmem:[#allocation13 + $0x30] sm:$0xff] }
 0x361   : > { %1648 = vmatprep.subr.bf16.mxu1 %v2068_v0  ;;  %v1655_v3 = vpack.c.bf16 %v1008_v2, %v1007_v1 }
 0x364   : > { %1650 = vmatpush3.bf16.msra.mxu1 %v1649_v60 }
 0x365   : > { %1651 = vmatprep.subr.bf16.mxu1 %v2068_v0 }
 0x368   : > { %1653 = vmatpush3.bf16.msra.mxu1 %v1652_v63 }
 0x369   : > { %1654 = vmatprep.subr.bf16.mxu1 %v2068_v0 }
 0x36c   : > { %1656 = vmatpush3.bf16.msra.mxu1 %v1655_v3 }
 0x36d   : > { %1657 = vmatprep.subr.bf16.mxu1 %v2068_v0 }
 0x370   : > { %1659 = vmatpush3.bf16.msra.mxu1 %v1658_v6 }
 0x371   : > { %1660 = vmatprep.subr.bf16.mxu1 %v2068_v0 }
 0x374   : > { %1662 = vmatpush3.bf16.msra.mxu1 %v1661_v9 }
 0x375   : > { %1663 = vmatprep.subr.bf16.mxu1 %v2068_v0 }
 0x378   : > { %1665 = vmatpush3.bf16.msra.mxu1 %v1664_v12 }
 0x379   : > { %1666 = vmatprep.subr.bf16.mxu1 %v2068_v0 }
 0x37c   : > { %1668 = vmatpush3.bf16.msra.mxu1 %v1667_v19 }
 0x432   : > { %v904_v14 = vpop.f32.mrb[2].mxu1 }
 0x433   : > { %v905_v15 = vadd.f32 %v1260_v13, %v904_v14  ;;  %v1472_v16 = vpop.f32.mrb[3].mxu1 }
 0x435   : > { %1506 = vmatmul.mubr.f32.vlgmr.msra.gmra.mrb[4].mxu0 %v905_v15 }
 0x508   : > { %v997_v0 = vpop.f32.mrb[4].mxu0 }
 0x509   : > { %v998_v21 = vadd.f32 %v1261_v20, %v997_v0  ;;  %v1507_v22 = vpop.f32.mrb[5].mxu0 }
 0x50b   : > { %1541 = vmatmul.mubr.f32.vlgmr.msra.gmra.mrb[4].mxu1 %v998_v21 }
 0x5de   : > { %v1090_v24 = vpop.f32.mrb[4].mxu1 }
 0x5df   : > { %v1091_v25 = vadd.f32 %v1262_v23, %v1090_v24  ;;  %v1542_v26 = vpop.f32.mrb[5].mxu1 }
 0x5e1   : > { %1094 = vst [vmem:[%s542_s20] sm:$0xff] %v1091_v25 }
 0x5e2   : > { %1992 = shalt.err (!%p1989_p3)
}
 0x5e3   : > { %s1993_s1 = scalar_lea.hbm %s2515_s12, 128  ;;  %s1997_s18 = scalar_lea.hbm %s2604_s19, 256 }
 0x5e4   : > { %p1994_p4 = scmp.ne.s32.totalorder %s2515_s12, %s1993_s1  ;;  %p1998_p8 = scmp.lt.u32.totalorder %s2515_s12, %s2604_s19 }
 0x5e5   : > { %p1999_p5 = scmp.lt.u32.totalorder %s1997_s18, %s1993_s1  ;;  %p2001_p6 = scmp.lt.u32.totalorder %s1993_s1, %s2515_s12 }
 0x5e6   : > { %p1995_p10 = pnand %p1994_p4, %p2605_p9 }
 0x5e7   : > { %p2000_p7 = por %p1999_p5, %p1998_p8 }
 0x5e8   : > { %p1996_p11 = pneg %p1995_p10 }
 0x5e9   : > { %p2002_p12 = por %p2001_p6, %p2000_p7 }
 0x5eb   : > { %p2003_p1 = pnand %p2002_p12, %p1996_p11 }
 0x5ed   : > { %2006 = shalt.err (!%p2003_p1)
}
 0x5ee   : > { %1695 = dma.vmem_to_hbm [thread:$0]  (%p2605_p9), %s2517_s13, 128, %s2515_s12, %s1096_s17  }
 0x5ef PF: > { %s1121_s29 = sand.u32 1, %s2045_s25   ;;  %p2606_p13 = scmp.ne.s32.totalorder %s2591_s24, 0 }
 0x5f0   : > { %p2607_p0 = scmp.ge.s32.totalorder %s2057_s28, 2  ;;  %s1122_s15 = scalar_lea.sflag [#allocation4], %s1121_s29 }
 0x5f2   : > { %p1721_p2 = pnand %p2607_p0, %p2606_p13 }
 0x5f4   : > { %2040 = dma.done.wait (!%p1721_p2), %s1122_s15, 128  }
 0x5f5   : > { %2042 = vsyncadd (!%p1721_p2), %s1122_s15, 4294967168  ;;  %p29_p3 = scmp.ge.s32.totalorder %s2336_s16, 4   ;;  %s2608_s25 = smov %s2049_s26 }
 0x5f6   : > { %s2609_s26 = smov %s2053_s27  ;;  %s2610_s27 = smov %s2347_s8 }
 0x5f7   : > { %s2611_s28 = smov %s2336_s16  ;;  %31 = sbr.rel (!%p29_p3) target bundleno = 15 (0xf), region = 141 }
 0x5fe   :  { %1127 = vsyncpa [#allocation3], 1 }
 0x5ff   :  { %1129 = vsyncpa [#allocation3 + $0x1], 1 }
 0x600   :  { %1130 = vsyncpa [#allocation6], 1 }
 0x601   :  { %1131 = vsyncpa [#allocation9], 1 }
 0x602   :  { %1132 = vsyncpa [#allocation12], 1 }
 0x603   :  { %1133 = vsyncpa [#allocation4], 1 }
 0x604   :  { %1135 = vsyncpa [#allocation4 + $0x1], 1 }

// kernel: tpu_custom_call.1
= control target key start
LH: loop header
LB: loop body
LE: loop exit
PB: predicated region body
PF: predicated region fallthrough
CT: control target
= control target key end

     0   :  { %s2559_s0 = inlined_call_operand.hbm [shape: f32[16,32], index: 0, kind: input, shape index: {}]   ;;  %s2560_s1 = inlined_call_operand.hbm [shape: f32[32,128], index: 1, kind: input, shape index: {}]   ;;  %s2561_s2 = inlined_call_operand.vmem [shape: f32[1,128], index: 2, kind: input, shape index: {}]   ;;  %s2562_s3 = inlined_call_operand.hbm [shape: f32[128,128], index: 3, kind: input, shape index: {}]   ;;  %s2563_s4 = inlined_call_operand.vmem [shape: f32[1,128], index: 4, kind: input, shape index: {}]   ;;  %s2564_s5 = inlined_call_operand.hbm [shape: f32[128,128], index: 5, kind: input, shape index: {}]   ;;  %s2565_s6 = inlined_call_operand.vmem [shape: f32[1,128], index: 6, kind: input, shape index: {}]   ;;  %s2566_s7 = inlined_call_operand.hbm [shape: f32[128,128], index: 7, kind: input, shape index: {}]   ;;  %s2567_s8 = inlined_call_operand.vmem [shape: f32[1,128], index: 8, kind: input, shape index: {}]   ;;  %s2568_s9 = inlined_call_operand.hbm [shape: f32[128,128], index: 9, kind: input, shape index: {}]   ;;  %s2569_s10 = inlined_call_operand.vmem [shape: f32[1,128], index: 10, kind: input, shape index: {}]   ;;  %s2570_s11 = inlined_call_operand.hbm [shape: f32[128,128], index: 11, kind: input, shape index: {}]   ;;  %s2571_s12 = inlined_call_operand.vmem [shape: f32[1,128], index: 12, kind: input, shape index: {}]   ;;  %s2572_s13 = inlined_call_operand.hbm [shape: f32[16,128], index: 13, kind: output, shape index: {}]  }
   0x1   :  { %2577 = sst [smem:[#allocation20_spill]] %s2560_s1 }
   0x2   :  { %2578 = sst [smem:[#allocation21_spill]] %s2565_s6 }
   0x3   :  { %2579 = sst [smem:[#allocation22_spill]] %s2567_s8 }
   0x4   :  { %2580 = sst [smem:[#allocation23_spill]] %s2569_s10 }
   0x5   :  { %2581 = sst [smem:[#allocation24_spill]] %s2571_s12 }
   0x6   :  { %2582 = sst [smem:[#allocation25_spill]] %s2572_s13 }
   0x7   :  { %18 = vsyncpa [#allocation3], 0 }
   0x8   :  { %20 = vsyncpa [#allocation3 + $0x1], 0 }
   0x9   :  { %21 = vsyncpa [#allocation6], 0 }
   0xa   :  { %22 = vsyncpa [#allocation9], 0 }
   0xb   :  { %23 = vsyncpa [#allocation12], 0 }
   0xc   :  { %24 = vsyncpa [#allocation4], 0 }
   0xd   :  { %26 = vsyncpa [#allocation4 + $0x1], 0  ;;  %s2142_s25 = smov 0   ;;  %s2144_s26 = smov 0  }
   0xe   :  { %s2146_s27 = smov 0   ;;  %s2148_s28 = smov 0  }
   0xf LB: > { %s2059_s29 = smov [#allocation5]   ;;  %s2163_s14 = sadd.s32 4294967295, %s2057_s28   ;;  %s2057_s28 = sphi %s2148_s28, %s2611_s28   ;;  %s2053_s27 = sphi %s2146_s27, %s2610_s27   ;;  %s2049_s26 = sphi %s2144_s26, %s2609_s26   ;;  %s2045_s25 = sphi %s2142_s25, %s2608_s25  }
  0x10   : > { %s353_s30 = sshll.u32 %s2059_s29, 4  ;;  %p1237_p0 = scmp.ge.s32.totalorder %s2057_s28, 1  ;;  %s2168_s30 = int_to_ptr.vmem [resolvable:$true] %s353_s30 }
  0x11   : > { %p2574_p1 = scmp.eq.s32.totalorder %s2163_s14, 0  ;;  %p341_p2 = scmp.lt.s32.totalorder %s2057_s28, 3 }
  0x12   : > { %s2060_s16 = smov [#allocation8]   ;;  %s2061_s19 = smov [#allocation11]  }
  0x13   : > { %p2170_p3 = pnand %p1237_p0, %p341_p2  ;;  %s385_s17 = sshll.u32 %s2060_s16, 4  ;;  %s2183_s17 = int_to_ptr.vmem [resolvable:$true] %s385_s17 }
  0x14   : > { %s417_s20 = sshll.u32 %s2061_s19, 4  ;;  %s2585_s1 = sld [smem:[#allocation20_spill]]  ;;  %s2185_s20 = int_to_ptr.vmem [resolvable:$true] %s417_s20 }
  0x15   : > { %s2583_s15 = scalar_select %p2170_p3, 1, 0 }
  0x16   : > { %p1697_p5 = pneg %p2170_p3 }
  0x18   : > { %p2179_p6 = pnand %p1697_p5, %p2574_p1 }
  0x1a   : > { %s1781_s23 = scalar_lea.hbm %s2585_s1, 512  ;;  %p2195_p8 = pneg %p2179_p6 }
  0x1b   : > { %p1782_p7 = scmp.ne.s32.totalorder %s2585_s1, %s1781_s23  ;;  %p1788_p11 = scmp.lt.u32.totalorder %s1781_s23, %s2585_s1 }
  0x1d   : > { %p1784_p9 = pnand %p2195_p8, %p1782_p7 }
  0x1f   : > { %p1785_p10 = pneg %p1784_p9 }
  0x21   : > { %p1790_p12 = pnand %p1788_p11, %p1785_p10 }
  0x23   : > { %1793 = shalt.err (!%p1790_p12)
}
  0x24   : > { %s1794_s21 = scalar_lea.vmem %s2168_s30, 512  ;;  %p1802_p5 = scmp.lt.s32.totalorder %s2168_s30, %s2168_s30 }
  0x25   : > { %p1795_p13 = scmp.ne.s32.totalorder %s2168_s30, %s1794_s21  ;;  %p1803_p4 = scmp.lt.s32.totalorder %s1794_s21, %s1794_s21 }
  0x27   : > { %p1797_p0 = pnand %p1795_p13, %p2195_p8  ;;  %p1804_p7 = por %p1803_p4, %p1802_p5 }
  0x29   : > { %p1798_p2 = pneg %p1797_p0 }
  0x2b   : > { %p1805_p9 = pnand %p1804_p7, %p1798_p2 }
  0x2d   : > { %1808 = shalt.err (!%p1805_p9)
}
  0x2e   : > { %s2062_s22 = smov 128   ;;  %s2063_s13 = smov 8  }
  0x2f   : > { %1700 = dma.hbm_to_vmem [thread:$0]  (!%p2179_p6), %s2585_s1, 512, %s2168_s30, [#allocation6], %s2062_s22, %s2062_s22, %s2063_s13  }
  0x30   : > { %s1809_s21 = scalar_lea.hbm %s2564_s5, 2048 }
  0x31   : > { %p1810_p4 = scmp.ne.s32.totalorder %s2564_s5, %s1809_s21  ;;  %p1816_p12 = scmp.lt.u32.totalorder %s1809_s21, %s2564_s5 }
  0x33   : > { %p1812_p10 = pnand %p1810_p4, %p2195_p8 }
  0x35   : > { %p1813_p11 = pneg %p1812_p10 }
  0x37   : > { %p1818_p13 = pnand %p1816_p12, %p1813_p11 }
  0x39   : > { %1821 = shalt.err (!%p1818_p13)
}
  0x3a   : > { %s1822_s30 = scalar_lea.vmem %s2183_s17, 2048  ;;  %p1830_p7 = scmp.lt.s32.totalorder %s2183_s17, %s2183_s17 }
  0x3b   : > { %p1823_p0 = scmp.ne.s32.totalorder %s2183_s17, %s1822_s30  ;;  %p1831_p9 = scmp.lt.s32.totalorder %s1822_s30, %s1822_s30 }
  0x3d   : > { %p1825_p2 = pnand %p1823_p0, %p2195_p8  ;;  %p1832_p4 = por %p1831_p9, %p1830_p7 }
  0x3f   : > { %p1826_p5 = pneg %p1825_p2 }
  0x41   : > { %p1833_p10 = pnand %p1832_p4, %p1826_p5 }
  0x43   : > { %1836 = shalt.err (!%p1833_p10)
}
  0x44   : > { %1706 = dma.hbm_to_vmem [thread:$0]  (!%p2179_p6), %s2564_s5, 2048, %s2183_s17, [#allocation9], %s2062_s22, %s2062_s22, %s2063_s13  }
  0x45   : > { %s1837_s23 = scalar_lea.hbm %s2568_s9, 2048 }
  0x46   : > { %p1838_p11 = scmp.ne.s32.totalorder %s2568_s9, %s1837_s23  ;;  %p1844_p0 = scmp.lt.u32.totalorder %s1837_s23, %s2568_s9 }
  0x48   : > { %p1840_p12 = pnand %p1838_p11, %p2195_p8 }
  0x4a   : > { %p1841_p13 = pneg %p1840_p12 }
  0x4c   : > { %p1846_p2 = pnand %p1844_p0, %p1841_p13 }
  0x4e   : > { %1849 = shalt.err (!%p1846_p2)
}
  0x4f   : > { %s1850_s17 = scalar_lea.vmem %s2185_s20, 2048  ;;  %p1858_p4 = scmp.lt.s32.totalorder %s2185_s20, %s2185_s20 }
  0x50   : > { %p1851_p5 = scmp.ne.s32.totalorder %s2185_s20, %s1850_s17  ;;  %p1859_p10 = scmp.lt.s32.totalorder %s1850_s17, %s1850_s17 }
  0x52   : > { %p1853_p7 = pnand %p1851_p5, %p2195_p8  ;;  %p1860_p11 = por %p1859_p10, %p1858_p4 }
  0x54   : > { %p1854_p9 = pneg %p1853_p7 }
  0x56   : > { %p1861_p12 = pnand %p1860_p11, %p1854_p9 }
  0x58   : > { %1864 = shalt.err (!%p1861_p12)
}
  0x59   : > { %1712 = dma.hbm_to_vmem [thread:$0]  (!%p2179_p6), %s2568_s9, 2048, %s2185_s20, [#allocation12], %s2062_s22, %s2062_s22, %s2063_s13  }
  0x5a   : > { %s2064_s8 = smov [#allocation7]   ;;  %s2065_s12 = smov [#allocation10]  }
  0x5b   : > { %s369_s10 = sshll.u32 %s2064_s8, 4  ;;  %s401_s23 = sshll.u32 %s2065_s12, 4  ;;  %s370_s10 = int_to_ptr.vmem [resolvable:$true] %s369_s10  ;;  %s402_s23 = int_to_ptr.vmem [resolvable:$true] %s401_s23 }
  0x5c   : > { %s1865_s19 = scalar_lea.hbm %s2562_s3, 2048 }
  0x5d   : > { %p1866_p13 = scmp.ne.s32.totalorder %s2562_s3, %s1865_s19  ;;  %p1872_p5 = scmp.lt.u32.totalorder %s1865_s19, %s2562_s3 }
  0x5f   : > { %p1868_p0 = pnand %p1866_p13, %p2195_p8 }
  0x61   : > { %p1869_p2 = pneg %p1868_p0 }
  0x63   : > { %p1874_p7 = pnand %p1872_p5, %p1869_p2 }
  0x65   : > { %1877 = shalt.err (!%p1874_p7)
}
  0x66   : > { %s1878_s20 = scalar_lea.vmem %s370_s10, 2048  ;;  %p1886_p11 = scmp.lt.s32.totalorder %s370_s10, %s370_s10 }
  0x67   : > { %p1879_p9 = scmp.ne.s32.totalorder %s370_s10, %s1878_s20  ;;  %p1887_p12 = scmp.lt.s32.totalorder %s1878_s20, %s1878_s20 }
  0x69   : > { %p1881_p4 = pnand %p1879_p9, %p2195_p8  ;;  %p1888_p1 = por %p1887_p12, %p1886_p11 }
  0x6b   : > { %p1882_p10 = pneg %p1881_p4 }
  0x6d   : > { %p1889_p3 = pnand %p1888_p1, %p1882_p10 }
  0x6f   : > { %1892 = shalt.err (!%p1889_p3)
}
  0x70   : > { %1703 = dma.hbm_to_vmem [thread:$0]  (!%p2179_p6), %s2562_s3, 2048, %s370_s10, [#allocation6], %s2062_s22, %s2062_s22, %s2063_s13  }
  0x71   : > { %s1893_s24 = scalar_lea.hbm %s2566_s7, 2048 }
  0x72   : > { %p1894_p1 = scmp.ne.s32.totalorder %s2566_s7, %s1893_s24  ;;  %p1900_p0 = scmp.lt.u32.totalorder %s1893_s24, %s2566_s7 }
  0x74   : > { %p1896_p3 = pnand %p1894_p1, %p2195_p8 }
  0x76   : > { %p1897_p13 = pneg %p1896_p3 }
  0x78   : > { %p1902_p2 = pnand %p1900_p0, %p1897_p13 }
  0x7a   : > { %1905 = shalt.err (!%p1902_p2)
}
  0x7b   : > { %s1906_s30 = scalar_lea.vmem %s402_s23, 2048  ;;  %p1914_p4 = scmp.lt.s32.totalorder %s402_s23, %s402_s23 }
  0x7c   : > { %p1907_p5 = scmp.ne.s32.totalorder %s402_s23, %s1906_s30  ;;  %p1915_p10 = scmp.lt.s32.totalorder %s1906_s30, %s1906_s30 }
  0x7e   : > { %p1909_p7 = pnand %p1907_p5, %p2195_p8  ;;  %p1916_p11 = por %p1915_p10, %p1914_p4 }
  0x80   : > { %p1910_p9 = pneg %p1909_p7 }
  0x82   : > { %p1917_p12 = pnand %p1916_p11, %p1910_p9 }
  0x84   : > { %1920 = shalt.err (!%p1917_p12)
}
  0x85   : > { %1709 = dma.hbm_to_vmem [thread:$0]  (!%p2179_p6), %s2566_s7, 2048, %s402_s23, [#allocation9], %s2062_s22, %s2062_s22, %s2063_s13  }
  0x86   : > { %s2066_s1 = smov [#allocation13]   ;;  %s1921_s24 = scalar_lea.hbm %s2570_s11, 2048 }
  0x87   : > { %s433_s6 = sshll.u32 %s2066_s1, 4  ;;  %p1922_p1 = scmp.ne.s32.totalorder %s2570_s11, %s1921_s24  ;;  %s434_s6 = int_to_ptr.vmem [resolvable:$true] %s433_s6 }
  0x88   : > { %p1928_p0 = scmp.lt.u32.totalorder %s1921_s24, %s2570_s11 }
  0x89   : > { %p1924_p3 = pnand %p1922_p1, %p2195_p8 }
  0x8b   : > { %p1925_p13 = pneg %p1924_p3 }
  0x8d   : > { %p1930_p2 = pnand %p1928_p0, %p1925_p13 }
  0x8f   : > { %1933 = shalt.err (!%p1930_p2)
}
  0x90   : > { %s1934_s23 = scalar_lea.vmem %s434_s6, 2048  ;;  %p1942_p4 = scmp.lt.s32.totalorder %s434_s6, %s434_s6 }
  0x91   : > { %p1935_p5 = scmp.ne.s32.totalorder %s434_s6, %s1934_s23  ;;  %p1943_p10 = scmp.lt.s32.totalorder %s1934_s23, %s1934_s23 }
  0x93   : > { %p1937_p7 = pnand %p1935_p5, %p2195_p8  ;;  %p1944_p11 = por %p1943_p10, %p1942_p4 }
  0x95   : > { %p1938_p9 = pneg %p1937_p7 }
  0x97   : > { %p1945_p12 = pnand %p1944_p11, %p1938_p9 }
  0x99   : > { %1948 = shalt.err (!%p1945_p12)
}
  0x9a   : > { %1715 = dma.hbm_to_vmem [thread:$0]  (!%p2179_p6), %s2570_s11, 2048, %s434_s6, [#allocation12], %s2062_s22, %s2062_s22, %s2063_s13  }
  0x9b   : > { %s1236_s18 = sadd.s32 4294967294, %s2057_s28   ;;  %s2336_s16 = sadd.s32 1, %s2057_s28  }
  0x9c   : > { %s36_s20 = ssub.s32 %s2057_s28, %s2336_s16  ;;  %s39_s1 = sadd.s32 1, %s2053_s27 }
  0x9d   : > { %p37_p8 = scmp.eq.s32.totalorder %s36_s20, 0  ;;  %p46_p1 = scmp.ne.s32.totalorder %s2053_s27, %s2049_s26 }
  0x9e   : > { %p47_p3 = scmp.eq.s32.totalorder %s2057_s28, 0  ;;  %p52_p13 = scmp.ne.s32.totalorder %s2049_s26, %s2045_s25 }
  0x9f   : > { %s2347_s8 = scalar_select %p37_p8, %s2053_s27, %s39_s1  }
  0xa0   : > { %p2349_p0 = por %p47_p3, %p46_p1  ;;  %p2588_p2 = scmp.eq.s32.totalorder %s2163_s14, 0 }
  0xa1   : > { %p328_p5 = scmp.eq.s32.totalorder %s2163_s14, 1  ;;  %p334_p7 = scmp.eq.s32.totalorder %s1236_s18, 1 }
  0xa2   : > { %p2355_p6 = por %p2588_p2, %p52_p13  ;;  %p1730_p9 = scmp.lt.s32.totalorder %s2057_s28, 2 }
  0xa3   : > { %s450_s13 = sand.u32 1, %s2053_s27   ;;  %p2362_p4 = por %p328_p5, %p46_p1 }
  0xa4   : > { %p2366_p10 = por %p334_p7, %p52_p13  ;;  %s1245_s29 = sshll.u32 %s450_s13, 3 }
  0xa5   : > { %s2590_s6 = scalar_select %p2362_p4, 1, 0 }
  0xa6   : > { %s2591_s24 = scalar_select %p2366_p10, 1, 0 }
  0xa7   : > { %s1246_s19 = sshll.u32 %s2057_s28, 7  ;;  %s454_s30 = scalar_lea.vmem [#allocation2], %s1245_s29 }
  0xa8   : > { %s2374_s23 = scalar_lea.hbm %s2559_s0, %s1246_s19  ;;  %s461_s10 = sshll.u32 %s454_s30, 4  ;;  %s2376_s10 = int_to_ptr.vmem [resolvable:$true] %s461_s10 }
  0xa9   : > { %p2380_p11 = pnand %p1730_p9, %p2349_p0  ;;  %s451_s20 = scalar_lea.sflag [#allocation3], %s450_s13 }
  0xaa   : > { %s1949_s1 = scalar_lea.hbm %s2374_s23, 128  ;;  %s1954_s21 = scalar_lea.hbm %s2559_s0, 256 }
  0xab   : > { %p1950_p12 = scmp.ne.s32.totalorder %s2374_s23, %s1949_s1  ;;  %p1951_p8 = pneg %p2380_p11 }
  0xac   : > { %p1955_p13 = scmp.lt.u32.totalorder %s2374_s23, %s2559_s0  ;;  %p1956_p0 = scmp.lt.u32.totalorder %s1954_s21, %s1949_s1 }
  0xad   : > { %p1952_p1 = pnand %p1951_p8, %p1950_p12  ;;  %p1958_p5 = scmp.lt.u32.totalorder %s1949_s1, %s2374_s23 }
  0xae   : > { %p1957_p2 = por %p1956_p0, %p1955_p13 }
  0xaf   : > { %p1953_p3 = pneg %p1952_p1 }
  0xb0   : > { %p1959_p7 = por %p1958_p5, %p1957_p2 }
  0xb2   : > { %p1960_p9 = pnand %p1959_p7, %p1953_p3 }
  0xb4   : > { %1963 = shalt.err (!%p1960_p9)
}
  0xb5   : > { %s1964_s13 = scalar_lea.vmem %s2376_s10, 128  ;;  %s2067_s30 = smov [#allocation2]  }
  0xb6   : > { %p1965_p12 = scmp.ne.s32.totalorder %s2376_s10, %s1964_s13  ;;  %s1969_s29 = sshll.u32 %s2067_s30, 4  ;;  %s1970_s29 = int_to_ptr.vmem [resolvable:$false] %s1969_s29 }
  0xb7   : > { %s1971_s19 = scalar_lea.vmem %s1970_s29, 256  ;;  %p1972_p4 = scmp.lt.s32.totalorder %s2376_s10, %s1970_s29 }
  0xb8   : > { %p1967_p1 = pnand %p1965_p12, %p1951_p8  ;;  %p1973_p13 = scmp.lt.s32.totalorder %s1971_s19, %s1964_s13 }
  0xba   : > { %p1968_p10 = pneg %p1967_p1  ;;  %p1974_p0 = por %p1973_p13, %p1972_p4 }
  0xbc   : > { %p1975_p2 = pnand %p1974_p0, %p1968_p10 }
  0xbe   : > { %1978 = shalt.err (!%p1975_p2)
}
  0xbf   : > { %1719 = dma.hbm_to_vmem [thread:$0]  (!%p2380_p11), %s2374_s23, 128, %s2376_s10, %s451_s20  }
  0xc0   : > { %p2593_p3 = scmp.ne.s32.totalorder %s2583_s15, 0 }
  0xc1   : > { %s2412_s1 = sand.u32 (!%p2593_p3), 1, %s2049_s26  }
  0xc2   : > { %470 = sbr.rel (%p2593_p3) target bundleno = 1519 (0x5ef), region = 72  ;;  %s1248_s21 = sshll.u32 (!%p2593_p3), %s2412_s1, 3 }
  0xc3   : > { %s473_s12 = scalar_lea.sflag (!%p2593_p3), [#allocation3], %s2412_s1  ;;  %s2418_s17 = scalar_lea.vmem (!%p2593_p3), [#allocation2], %s1248_s21 }
  0xc9   : > { %2024 = dma.done.wait (%p2355_p6), %s473_s12, 128  }
  0xca   : > { %2026 = vsyncadd (%p2355_p6), %s473_s12, 4294967168  ;;  %p2594_p4 = scmp.eq.s32.totalorder %s2163_s14, 0 }
  0xcc   : > { %2028 = dma.done.wait (%p2594_p4), [#allocation6], 2560   ;;  %p2595_p10 = pmov %p2594_p4 }
  0xcd   : > { %p2596_p11 = pmov %p2594_p4 }
  0xce   : > { %2030 = vsyncadd (%p2595_p10), [#allocation6], 4294964736 }
  0xcf   : > { %2032 = dma.done.wait (%p2596_p11), [#allocation9], 4096   ;;  %p2597_p8 = pmov %p2594_p4 }
  0xd0   : > { %p2598_p5 = pmov %p2594_p4 }
  0xd1   : > { %2034 = vsyncadd (%p2597_p8), [#allocation9], 4294963200 }
  0xd2   : > { %2036 = dma.done.wait (%p2598_p5), [#allocation12], 4096   ;;  %p2599_p7 = pmov %p2594_p4 }
  0xd3   : > { %v2068_v0 = vmov 0.0|0.0   ;;  %vm2069_vm0 = vmmov 0   ;;  %v2070_v1 = vmov 0.0   ;;  %v544_v2 = vld [vmem:[#allocation5] sm:$0xff]  ;;  %v545_v3 = vld [vmem:[#allocation5 + $0x8] sm:$0xff]  ;;  %v546_v4 = vld [vmem:[#allocation5 + $0x10] sm:$0xff] }
  0xd4   : > { %2038 = vsyncadd (%p2599_p7), [#allocation12], 4294963200  ;;  %1543 = vmatprep.subr.bf16.mxu0 %v2068_v0  ;;  %1365 = vmatprep.mubr.msk.f32.mxu0 %vm2069_vm0, %v2070_v1  ;;  %v1544_v5 = vpack.c.bf16 %v545_v3, %v544_v2  ;;  %v547_v6 = vld [vmem:[#allocation5 + $0x18] sm:$0xff]  ;;  %v629_v7 = vld [vmem:[#allocation7] sm:$0xff]  ;;  %vm555_vm1 = vcmask 261120   ;;  %s2600_s13 = sld [smem:[#allocation21_spill]] }
  0xd5   : > { %1549 = vmatprep.subr.bf16.mxu1 %v2068_v0  ;;  %1400 = vmatprep.mubr.msk.f32.mxu1 %vm2069_vm0, %v2070_v1  ;;  %v630_v8 = vld [vmem:[#allocation7 + $0x8] sm:$0xff]  ;;  %v631_v9 = vld [vmem:[#allocation7 + $0x10] sm:$0xff]  ;;  %v632_v10 = vld [vmem:[#allocation7 + $0x18] sm:$0xff]  ;;  %v1547_v11 = vpack.c.bf16 %v547_v6, %v546_v4  ;;  %s2601_s19 = sld [smem:[#allocation22_spill]]  ;;  %s2602_s15 = sld [smem:[#allocation23_spill]] }
  0xd6   : > { %1545 = vmatpush3.bf16.msra.mxu0 %v1544_v5  ;;  %v1550_v12 = vpack.c.bf16 %v630_v8, %v629_v7  ;;  %v1553_v13 = vpack.c.bf16 %v632_v10, %v631_v9  ;;  %v633_v14 = vld [vmem:[#allocation7 + $0x20] sm:$0xff]  ;;  %v634_v15 = vld [vmem:[#allocation7 + $0x28] sm:$0xff]  ;;  %v543_v16 = vld [vmem:[%s2418_s17] sm:$0xff]  ;;  %s2603_s10 = sld [smem:[#allocation24_spill]]  ;;  %s1264_s18 = sshll.u32 %s2163_s14, 7 }
  0xd7   : > { %1546 = vmatprep.subr.bf16.mxu0 %v2068_v0  ;;  %v1556_v17 = vpack.c.bf16 %v634_v15, %v633_v14  ;;  %v635_v18 = vld [vmem:[#allocation7 + $0x30] sm:$0xff]  ;;  %v636_v19 = vld [vmem:[#allocation7 + $0x38] sm:$0xff]  ;;  %v637_v21 = vld [vmem:[#allocation7 + $0x40] sm:$0xff]  ;;  %s542_s20 = scalar_lea.vmem [#allocation14], %s1248_s21  ;;  %s1096_s17 = scalar_lea.sflag [#allocation4], %s2412_s1 }
  0xd8   : > { %1551 = vmatpush3.bf16.msra.mxu1 %v1550_v12  ;;  %v1559_v20 = vpack.c.bf16 %v636_v19, %v635_v18  ;;  %v638_v22 = vld [vmem:[#allocation7 + $0x48] sm:$0xff]  ;;  %v639_v24 = vld [vmem:[#allocation7 + $0x50] sm:$0xff]  ;;  %v640_v25 = vld [vmem:[#allocation7 + $0x58] sm:$0xff]  ;;  %p2605_p9 = scmp.ne.s32.totalorder %s2590_s6, 0  ;;  %s2071_s14 = smov [#allocation14]  }
  0xd9   : > { %1552 = vmatprep.subr.bf16.mxu1 %v2068_v0  ;;  %v1562_v23 = vpack.c.bf16 %v638_v22, %v637_v21  ;;  %v1565_v26 = vpack.c.bf16 %v640_v25, %v639_v24  ;;  %v641_v27 = vld [vmem:[#allocation7 + $0x60] sm:$0xff]  ;;  %v642_v28 = vld [vmem:[#allocation7 + $0x68] sm:$0xff]  ;;  %v643_v30 = vld [vmem:[#allocation7 + $0x70] sm:$0xff]  ;;  %s1983_s21 = sshll.u32 %s2071_s14, 4  ;;  %s1984_s21 = int_to_ptr.vmem [resolvable:$false] %s1983_s21 }
  0xda   : > { %1548 = vmatpush3.bf16.msra.mxu0 %v1547_v11  ;;  %v1568_v29 = vpack.c.bf16 %v642_v28, %v641_v27  ;;  %v644_v31 = vld [vmem:[#allocation7 + $0x78] sm:$0xff]  ;;  %v722_v33 = vld [vmem:[#allocation8] sm:$0xff]  ;;  %v723_v34 = vld [vmem:[#allocation8 + $0x8] sm:$0xff]  ;;  %s1985_s22 = scalar_lea.vmem %s1984_s21, 256 }
  0xdb   : > { %1573 = vmatprep.subr.bf16.mxu0 %v2068_v0  ;;  %v1571_v32 = vpack.c.bf16 %v644_v31, %v643_v30  ;;  %v724_v35 = vld [vmem:[#allocation8 + $0x10] sm:$0xff]  ;;  %v1574_v36 = vpack.c.bf16 %v723_v34, %v722_v33  ;;  %v725_v37 = vld [vmem:[#allocation8 + $0x18] sm:$0xff]  ;;  %v726_v39 = vld [vmem:[#allocation8 + $0x20] sm:$0xff] }
  0xdc   : > { %1554 = vmatpush3.bf16.msra.mxu1 %v1553_v13  ;;  %v1577_v38 = vpack.c.bf16 %v725_v37, %v724_v35  ;;  %v727_v40 = vld [vmem:[#allocation8 + $0x28] sm:$0xff]  ;;  %v728_v42 = vld [vmem:[#allocation8 + $0x30] sm:$0xff]  ;;  %v729_v43 = vld [vmem:[#allocation8 + $0x38] sm:$0xff] }
  0xdd   : > { %1366 = vmatmul.mubr.msk.f32.vlgmr.msra.gmra.mrb[0].mxu0 %vm555_vm1, %v543_v16  ;;  %1555 = vmatprep.subr.bf16.mxu1 %v2068_v0  ;;  %v1580_v41 = vpack.c.bf16 %v727_v40, %v726_v39  ;;  %v1583_v44 = vpack.c.bf16 %v729_v43, %v728_v42  ;;  %v730_v45 = vld [vmem:[#allocation8 + $0x40] sm:$0xff]  ;;  %v731_v46 = vld [vmem:[#allocation8 + $0x48] sm:$0xff]  ;;  %v732_v48 = vld [vmem:[#allocation8 + $0x50] sm:$0xff] }
  0xde   : > { %1435 = vmatprep.mubr.msk.f32.mxu0 %vm2069_vm0, %v2070_v1  ;;  %1575 = vmatpush3.bf16.msra.mxu0 %v1574_v36  ;;  %v1586_v47 = vpack.c.bf16 %v731_v46, %v730_v45  ;;  %v733_v49 = vld [vmem:[#allocation8 + $0x58] sm:$0xff]  ;;  %v734_v51 = vld [vmem:[#allocation8 + $0x60] sm:$0xff]  ;;  %v735_v52 = vld [vmem:[#allocation8 + $0x68] sm:$0xff] }
  0xdf   : > { %1576 = vmatprep.subr.bf16.mxu0 %v2068_v0  ;;  %v1589_v50 = vpack.c.bf16 %v733_v49, %v732_v48  ;;  %v1592_v53 = vpack.c.bf16 %v735_v52, %v734_v51  ;;  %v1256_v54 = vld [vmem:[%s2561_s2] ss:$0 sm:$0xff]  ;;  %v737_v59 = vld [vmem:[#allocation8 + $0x78] sm:$0xff]  ;;  %v815_v61 = vld [vmem:[#allocation10] sm:$0xff] }
  0xe0   : > { %1557 = vmatpush3.bf16.msra.mxu1 %v1556_v17  ;;  %v736_v58 = vld [vmem:[#allocation8 + $0x70] sm:$0xff]  ;;  %v816_v62 = vld [vmem:[#allocation10 + $0x8] sm:$0xff]  ;;  %v818_v3 = vld [vmem:[#allocation10 + $0x18] sm:$0xff] }
  0xe1   : > { %1558 = vmatprep.subr.bf16.mxu1 %v2068_v0  ;;  %v1595_v60 = vpack.c.bf16 %v737_v59, %v736_v58  ;;  %v817_v63 = vld [vmem:[#allocation10 + $0x10] sm:$0xff]  ;;  %v1598_v2 = vpack.c.bf16 %v816_v62, %v815_v61  ;;  %v819_v5 = vld [vmem:[#allocation10 + $0x20] sm:$0xff]  ;;  %v820_v6 = vld [vmem:[#allocation10 + $0x28] sm:$0xff] }
  0xe2   : > { %1578 = vmatpush3.bf16.msra.mxu0 %v1577_v38  ;;  %v1601_v4 = vpack.c.bf16 %v818_v3, %v817_v63  ;;  %v1604_v7 = vpack.c.bf16 %v820_v6, %v819_v5  ;;  %v821_v8 = vld [vmem:[#allocation10 + $0x30] sm:$0xff]  ;;  %v822_v9 = vld [vmem:[#allocation10 + $0x38] sm:$0xff]  ;;  %v823_v11 = vld [vmem:[#allocation10 + $0x40] sm:$0xff] }
  0xe3   : > { %1579 = vmatprep.subr.bf16.mxu0 %v2068_v0  ;;  %v1607_v10 = vpack.c.bf16 %v822_v9, %v821_v8  ;;  %v824_v12 = vld [vmem:[#allocation10 + $0x48] sm:$0xff]  ;;  %v825_v14 = vld [vmem:[#allocation10 + $0x50] sm:$0xff]  ;;  %v826_v15 = vld [vmem:[#allocation10 + $0x58] sm:$0xff] }
  0xe4   : > { %1560 = vmatpush3.bf16.msra.mxu1 %v1559_v20  ;;  %v1610_v13 = vpack.c.bf16 %v824_v12, %v823_v11  ;;  %v1613_v16 = vpack.c.bf16 %v826_v15, %v825_v14  ;;  %v827_v17 = vld [vmem:[#allocation10 + $0x60] sm:$0xff]  ;;  %v828_v18 = vld [vmem:[#allocation10 + $0x68] sm:$0xff]  ;;  %v1258_v20 = vld [vmem:[%s2563_s4] ss:$0 sm:$0xff] }
  0xe5   : > { %1561 = vmatprep.subr.bf16.mxu1 %v2068_v0  ;;  %v1616_v19 = vpack.c.bf16 %v828_v18, %v827_v17  ;;  %v829_v24 = vld [vmem:[#allocation10 + $0x70] sm:$0xff]  ;;  %v830_v25 = vld [vmem:[#allocation10 + $0x78] sm:$0xff]  ;;  %v908_v27 = vld [vmem:[#allocation11] sm:$0xff] }
  0xe6   : > { %1581 = vmatpush3.bf16.msra.mxu0 %v1580_v41  ;;  %v909_v28 = vld [vmem:[#allocation11 + $0x8] sm:$0xff]  ;;  %v911_v31 = vld [vmem:[#allocation11 + $0x18] sm:$0xff]  ;;  %v912_v33 = vld [vmem:[#allocation11 + $0x20] sm:$0xff] }
  0xe7   : > { %1582 = vmatprep.subr.bf16.mxu0 %v2068_v0  ;;  %v1622_v30 = vpack.c.bf16 %v909_v28, %v908_v27  ;;  %v913_v34 = vld [vmem:[#allocation11 + $0x28] sm:$0xff]  ;;  %v914_v36 = vld [vmem:[#allocation11 + $0x30] sm:$0xff]  ;;  %v915_v37 = vld [vmem:[#allocation11 + $0x38] sm:$0xff] }
  0xe8   : > { %1563 = vmatpush3.bf16.msra.mxu1 %v1562_v23  ;;  %v1628_v35 = vpack.c.bf16 %v913_v34, %v912_v33  ;;  %v1631_v38 = vpack.c.bf16 %v915_v37, %v914_v36  ;;  %v916_v39 = vld [vmem:[#allocation11 + $0x40] sm:$0xff]  ;;  %v917_v40 = vld [vmem:[#allocation11 + $0x48] sm:$0xff]  ;;  %v918_v42 = vld [vmem:[#allocation11 + $0x50] sm:$0xff] }
  0xe9   : > { %1564 = vmatprep.subr.bf16.mxu1 %v2068_v0  ;;  %v1634_v41 = vpack.c.bf16 %v917_v40, %v916_v39  ;;  %v919_v43 = vld [vmem:[#allocation11 + $0x58] sm:$0xff]  ;;  %v920_v45 = vld [vmem:[#allocation11 + $0x60] sm:$0xff]  ;;  %v921_v46 = vld [vmem:[#allocation11 + $0x68] sm:$0xff] }
  0xea   : > { %1584 = vmatpush3.bf16.msra.mxu0 %v1583_v44  ;;  %v1637_v44 = vpack.c.bf16 %v919_v43, %v918_v42  ;;  %v1259_v48 = vld [vmem:[%s2600_s13] ss:$0 sm:$0xff]  ;;  %v1004_v59 = vld [vmem:[#allocation13 + $0x18] sm:$0xff]  ;;  %v1005_v61 = vld [vmem:[#allocation13 + $0x20] sm:$0xff]  ;;  %s1109_s13 = sshll.u32 %s542_s20, 4  ;;  %s2517_s13 = int_to_ptr.vmem [resolvable:$true] %s1109_s13 }
  0xeb   : > { %1585 = vmatprep.subr.bf16.mxu0 %v2068_v0  ;;  %v922_v52 = vld [vmem:[#allocation11 + $0x70] sm:$0xff]  ;;  %v1006_v62 = vld [vmem:[#allocation13 + $0x28] sm:$0xff]  ;;  %v1012_v8 = vld [vmem:[#allocation13 + $0x58] sm:$0xff]  ;;  %p1986_p13 = scmp.lt.s32.totalorder %s2517_s13, %s1984_s21 }
  0xec   : > { %1566 = vmatpush3.bf16.msra.mxu1 %v1565_v26  ;;  %v1619_v26 = vpack.c.bf16 %v830_v25, %v829_v24  ;;  %v1652_v63 = vpack.c.bf16 %v1006_v62, %v1005_v61  ;;  %v1010_v5 = vld [vmem:[#allocation13 + $0x48] sm:$0xff]  ;;  %v1015_v17 = vld [vmem:[#allocation13 + $0x70] sm:$0xff]  ;;  %v1016_v18 = vld [vmem:[#allocation13 + $0x78] sm:$0xff] }
  0xed   : > { %1567 = vmatprep.subr.bf16.mxu1 %v2068_v0  ;;  %v1014_v11 = vld [vmem:[#allocation13 + $0x68] sm:$0xff] }
  0xee   : > { %1587 = vmatpush3.bf16.msra.mxu0 %v1586_v47  ;;  %v1640_v47 = vpack.c.bf16 %v921_v46, %v920_v45 }
  0xef   : > { %1588 = vmatprep.subr.bf16.mxu0 %v2068_v0 }
  0xf0   : > { %1569 = vmatpush3.bf16.msra.mxu1 %v1568_v29  ;;  %v910_v29 = vld [vmem:[#allocation11 + $0x10] sm:$0xff] }
  0xf1   : > { %1570 = vmatprep.subr.bf16.mxu1 %v2068_v0 }
  0xf2   : > { %1590 = vmatpush3.bf16.msra.mxu0 %v1589_v50 }
  0xf3   : > { %1591 = vmatprep.subr.bf16.mxu0 %v2068_v0 }
  0xf4   : > { %1572 = vmatpush3.bf16.msra.mxu1 %v1571_v32  ;;  %v1625_v32 = vpack.c.bf16 %v911_v31, %v910_v29 }
  0xf5   : > { %1597 = vmatprep.subr.bf16.mxu1 %v2068_v0 }
  0xf6   : > { %1593 = vmatpush3.bf16.msra.mxu0 %v1592_v53  ;;  %v923_v53 = vld [vmem:[#allocation11 + $0x78] sm:$0xff] }
  0xf7   : > { %1594 = vmatprep.subr.bf16.mxu0 %v2068_v0 }
  0xfa   : > { %1596 = vmatpush3.bf16.msra.mxu0 %v1595_v60 }
  0xfb   : > { %1621 = vmatprep.subr.bf16.mxu0 %v2068_v0 }
 0x1b0   : > { %v625_v55 = vpop.f32.mrb[0].mxu0 }
 0x1b1   : > { %v626_v56 = vadd.f32 %v1256_v54, %v625_v55  ;;  %v1367_v57 = vpop.f32.mrb[1].mxu0  ;;  %v1643_v54 = vpack.c.bf16 %v923_v53, %v922_v52  ;;  %v1001_v55 = vld [vmem:[#allocation13] sm:$0xff] }
 0x1b2   : > { %v1003_v57 = vld [vmem:[#allocation13 + $0x10] sm:$0xff] }
 0x1b3   : > { %1401 = vmatmul.mubr.f32.vlgmr.msra.gmra.mrb[0].mxu1 %v626_v56  ;;  %v1002_v56 = vld [vmem:[#allocation13 + $0x8] sm:$0xff]  ;;  %v1649_v60 = vpack.c.bf16 %v1004_v59, %v1003_v57 }
 0x1b4   : > { %1470 = vmatprep.mubr.msk.f32.mxu1 %vm2069_vm0, %v2070_v1  ;;  %1599 = vmatpush3.bf16.msra.mxu1 %v1598_v2  ;;  %v1646_v58 = vpack.c.bf16 %v1002_v56, %v1001_v55  ;;  %v1008_v2 = vld [vmem:[#allocation13 + $0x38] sm:$0xff] }
 0x1b5   : > { %1600 = vmatprep.subr.bf16.mxu1 %v2068_v0 }
 0x1b8   : > { %1602 = vmatpush3.bf16.msra.mxu1 %v1601_v4  ;;  %v1009_v4 = vld [vmem:[#allocation13 + $0x40] sm:$0xff] }
 0x1b9   : > { %1603 = vmatprep.subr.bf16.mxu1 %v2068_v0  ;;  %v1658_v6 = vpack.c.bf16 %v1010_v5, %v1009_v4 }
 0x1bc   : > { %1605 = vmatpush3.bf16.msra.mxu1 %v1604_v7  ;;  %v1011_v7 = vld [vmem:[#allocation13 + $0x50] sm:$0xff] }
 0x1bd   : > { %1606 = vmatprep.subr.bf16.mxu1 %v2068_v0  ;;  %v1661_v9 = vpack.c.bf16 %v1012_v8, %v1011_v7 }
 0x1c0   : > { %1608 = vmatpush3.bf16.msra.mxu1 %v1607_v10  ;;  %v1013_v10 = vld [vmem:[#allocation13 + $0x60] sm:$0xff] }
 0x1c1   : > { %1609 = vmatprep.subr.bf16.mxu1 %v2068_v0  ;;  %v1664_v12 = vpack.c.bf16 %v1014_v11, %v1013_v10 }
 0x1c4   : > { %1611 = vmatpush3.bf16.msra.mxu1 %v1610_v13  ;;  %v1260_v13 = vld [vmem:[%s2601_s19] ss:$0 sm:$0xff]  ;;  %s2604_s19 = sld [smem:[#allocation25_spill]] }
 0x1c5   : > { %1612 = vmatprep.subr.bf16.mxu1 %v2068_v0 }
 0x1c8   : > { %1614 = vmatpush3.bf16.msra.mxu1 %v1613_v16 }
 0x1c9   : > { %1615 = vmatprep.subr.bf16.mxu1 %v2068_v0 }
 0x1ca   : > { %s2515_s12 = scalar_lea.hbm %s2604_s19, %s1264_s18 }
 0x1cc   : > { %1617 = vmatpush3.bf16.msra.mxu1 %v1616_v19  ;;  %v1667_v19 = vpack.c.bf16 %v1016_v18, %v1015_v17 }
 0x1cd   : > { %1618 = vmatprep.subr.bf16.mxu1 %v2068_v0 }
 0x1d0   : > { %1620 = vmatpush3.bf16.msra.mxu1 %v1619_v26 }
 0x1d1   : > { %1645 = vmatprep.subr.bf16.mxu1 %v2068_v0 }
 0x286   : > { %v718_v21 = vpop.f32.mrb[0].mxu1 }
 0x287   : > { %v719_v22 = vadd.f32 %v1258_v20, %v718_v21  ;;  %v1402_v23 = vpop.f32.mrb[1].mxu1  ;;  %v1261_v20 = vld [vmem:[%s2602_s15] ss:$0 sm:$0xff]  ;;  %s1979_s15 = scalar_lea.vmem %s2517_s13, 128 }
 0x288   : > { %v1262_v23 = vld [vmem:[%s2603_s10] ss:$0 sm:$0xff]  ;;  %p1980_p6 = scmp.ne.s32.totalorder %s2517_s13, %s1979_s15  ;;  %p1987_p0 = scmp.lt.s32.totalorder %s1985_s22, %s1979_s15 }
 0x289   : > { %1436 = vmatmul.mubr.f32.vlgmr.msra.gmra.mrb[2].mxu0 %v719_v22 }
 0x28a   : > { %1505 = vmatprep.mubr.msk.f32.mxu0 %vm2069_vm0, %v2070_v1  ;;  %1623 = vmatpush3.bf16.msra.mxu0 %v1622_v30  ;;  %p1981_p12 = pnand %p1980_p6, %p2605_p9  ;;  %p1988_p2 = por %p1987_p0, %p1986_p13 }
 0x28b   : > { %1624 = vmatprep.subr.bf16.mxu0 %v2068_v0 }
 0x28c   : > { %p1982_p1 = pneg %p1981_p12 }
 0x28e   : > { %1626 = vmatpush3.bf16.msra.mxu0 %v1625_v32  ;;  %p1989_p3 = pnand %p1988_p2, %p1982_p1 }
 0x28f   : > { %1627 = vmatprep.subr.bf16.mxu0 %v2068_v0 }
 0x292   : > { %1629 = vmatpush3.bf16.msra.mxu0 %v1628_v35 }
 0x293   : > { %1630 = vmatprep.subr.bf16.mxu0 %v2068_v0 }
 0x296   : > { %1632 = vmatpush3.bf16.msra.mxu0 %v1631_v38 }
 0x297   : > { %1633 = vmatprep.subr.bf16.mxu0 %v2068_v0 }
 0x29a   : > { %1635 = vmatpush3.bf16.msra.mxu0 %v1634_v41 }
 0x29b   : > { %1636 = vmatprep.subr.bf16.mxu0 %v2068_v0 }
 0x29e   : > { %1638 = vmatpush3.bf16.msra.mxu0 %v1637_v44 }
 0x29f   : > { %1639 = vmatprep.subr.bf16.mxu0 %v2068_v0 }
 0x2a2   : > { %1641 = vmatpush3.bf16.msra.mxu0 %v1640_v47 }
 0x2a3   : > { %1642 = vmatprep.subr.bf16.mxu0 %v2068_v0 }
 0x2a6   : > { %1644 = vmatpush3.bf16.msra.mxu0 %v1643_v54 }
 0x35c   : > { %v811_v49 = vpop.f32.mrb[2].mxu0 }
 0x35d   : > { %v812_v50 = vadd.f32 %v1259_v48, %v811_v49  ;;  %v1437_v51 = vpop.f32.mrb[3].mxu0 }
 0x35f   : > { %1471 = vmatmul.mubr.f32.vlgmr.msra.gmra.mrb[2].mxu1 %v812_v50 }
 0x360   : > { %1540 = vmatprep.mubr.msk.f32.mxu1 %vm2069_vm0, %v2070_v1  ;;  %1647 = vmatpush3.bf16.msra.mxu1 %v1646_v58  ;;  %v1007_v1 = vld [vmem:[#allocation13 + $0x30] sm:$0xff] }
 0x361   : > { %1648 = vmatprep.subr.bf16.mxu1 %v2068_v0  ;;  %v1655_v3 = vpack.c.bf16 %v1008_v2, %v1007_v1 }
 0x364   : > { %1650 = vmatpush3.bf16.msra.mxu1 %v1649_v60 }
 0x365   : > { %1651 = vmatprep.subr.bf16.mxu1 %v2068_v0 }
 0x368   : > { %1653 = vmatpush3.bf16.msra.mxu1 %v1652_v63 }
 0x369   : > { %1654 = vmatprep.subr.bf16.mxu1 %v2068_v0 }
 0x36c   : > { %1656 = vmatpush3.bf16.msra.mxu1 %v1655_v3 }
 0x36d   : > { %1657 = vmatprep.subr.bf16.mxu1 %v2068_v0 }
 0x370   : > { %1659 = vmatpush3.bf16.msra.mxu1 %v1658_v6 }
 0x371   : > { %1660 = vmatprep.subr.bf16.mxu1 %v2068_v0 }
 0x374   : > { %1662 = vmatpush3.bf16.msra.mxu1 %v1661_v9 }
 0x375   : > { %1663 = vmatprep.subr.bf16.mxu1 %v2068_v0 }
 0x378   : > { %1665 = vmatpush3.bf16.msra.mxu1 %v1664_v12 }
 0x379   : > { %1666 = vmatprep.subr.bf16.mxu1 %v2068_v0 }
 0x37c   : > { %1668 = vmatpush3.bf16.msra.mxu1 %v1667_v19 }
 0x432   : > { %v904_v14 = vpop.f32.mrb[2].mxu1 }
 0x433   : > { %v905_v15 = vadd.f32 %v1260_v13, %v904_v14  ;;  %v1472_v16 = vpop.f32.mrb[3].mxu1 }
 0x435   : > { %1506 = vmatmul.mubr.f32.vlgmr.msra.gmra.mrb[4].mxu0 %v905_v15 }
 0x508   : > { %v997_v0 = vpop.f32.mrb[4].mxu0 }
 0x509   : > { %v998_v21 = vadd.f32 %v1261_v20, %v997_v0  ;;  %v1507_v22 = vpop.f32.mrb[5].mxu0 }
 0x50b   : > { %1541 = vmatmul.mubr.f32.vlgmr.msra.gmra.mrb[4].mxu1 %v998_v21 }
 0x5de   : > { %v1090_v24 = vpop.f32.mrb[4].mxu1 }
 0x5df   : > { %v1091_v25 = vadd.f32 %v1262_v23, %v1090_v24  ;;  %v1542_v26 = vpop.f32.mrb[5].mxu1 }
 0x5e1   : > { %1094 = vst [vmem:[%s542_s20] sm:$0xff] %v1091_v25 }
 0x5e2   : > { %1992 = shalt.err (!%p1989_p3)
}
 0x5e3   : > { %s1993_s1 = scalar_lea.hbm %s2515_s12, 128  ;;  %s1997_s18 = scalar_lea.hbm %s2604_s19, 256 }
 0x5e4   : > { %p1994_p4 = scmp.ne.s32.totalorder %s2515_s12, %s1993_s1  ;;  %p1998_p8 = scmp.lt.u32.totalorder %s2515_s12, %s2604_s19 }
 0x5e5   : > { %p1999_p5 = scmp.lt.u32.totalorder %s1997_s18, %s1993_s1  ;;  %p2001_p6 = scmp.lt.u32.totalorder %s1993_s1, %s2515_s12 }
 0x5e6   : > { %p1995_p10 = pnand %p1994_p4, %p2605_p9 }
 0x5e7   : > { %p2000_p7 = por %p1999_p5, %p1998_p8 }
 0x5e8   : > { %p1996_p11 = pneg %p1995_p10 }
 0x5e9   : > { %p2002_p12 = por %p2001_p6, %p2000_p7 }
 0x5eb   : > { %p2003_p1 = pnand %p2002_p12, %p1996_p11 }
 0x5ed   : > { %2006 = shalt.err (!%p2003_p1)
}
 0x5ee   : > { %1695 = dma.vmem_to_hbm [thread:$0]  (%p2605_p9), %s2517_s13, 128, %s2515_s12, %s1096_s17  }
 0x5ef PF: > { %s1121_s29 = sand.u32 1, %s2045_s25   ;;  %p2606_p13 = scmp.ne.s32.totalorder %s2591_s24, 0 }
 0x5f0   : > { %p2607_p0 = scmp.ge.s32.totalorder %s2057_s28, 2  ;;  %s1122_s15 = scalar_lea.sflag [#allocation4], %s1121_s29 }
 0x5f2   : > { %p1721_p2 = pnand %p2607_p0, %p2606_p13 }
 0x5f4   : > { %2040 = dma.done.wait (!%p1721_p2), %s1122_s15, 128  }
 0x5f5   : > { %2042 = vsyncadd (!%p1721_p2), %s1122_s15, 4294967168  ;;  %p29_p3 = scmp.ge.s32.totalorder %s2336_s16, 4   ;;  %s2608_s25 = smov %s2049_s26 }
 0x5f6   : > { %s2609_s26 = smov %s2053_s27  ;;  %s2610_s27 = smov %s2347_s8 }
 0x5f7   : > { %s2611_s28 = smov %s2336_s16  ;;  %31 = sbr.rel (!%p29_p3) target bundleno = 15 (0xf), region = 141 }
 0x5fe   :  { %1127 = vsyncpa [#allocation3], 1 }
 0x5ff   :  { %1129 = vsyncpa [#allocation3 + $0x1], 1 }
 0x600   :  { %1130 = vsyncpa [#allocation6], 1 }
 0x601   :  { %1131 = vsyncpa [#allocation9], 1 }
 0x602   :  { %1132 = vsyncpa [#allocation12], 1 }
 0x603   :  { %1133 = vsyncpa [#allocation4], 1 }
 0x604   :  { %1135 = vsyncpa [#allocation4 + $0x1], 1 }

</bundles_post_ra>
